<compile_context>
chip_gen: v6e
topology: v6e:2x2x1
jax: 0.10.0
libtpu: 0.0.40
codegen_flags: <defaults>
</compile_context>

<pallas_src>
import jax
import jax.numpy as jnp
from jax.experimental import pallas as pl
from jax.experimental.pallas import tpu as pltpu

EPS = 1e-5


def _resblock_kernel(x_ref, w1_ref, g1_ref, be1_ref, w2_ref, g2_ref, be2_ref,
                     o_ref):
    N, H, W, C = x_ref.shape
    M = N * H * W

    x = x_ref[...]  # (N, H, W, C) f32

    def pad_hw1(t):
        """Zero-pad H and W by 1 on each side, via concatenation (in-register)."""
        n, h, w, c = t.shape
        zw = jnp.zeros((n, h, 1, c), t.dtype)
        t = jnp.concatenate([zw, t, zw], axis=2)          # pad W
        zh = jnp.zeros((n, 1, w + 2, c), t.dtype)
        return jnp.concatenate([zh, t, zh], axis=1)       # pad H

    def conv3x3(t_nhwc, w_ref):
        """3x3 same conv as one im2col matmul: (M, 9C) x (9C, C)."""
        tp = pad_hw1(t_nhwc)
        taps = [tp[:, kh:kh + H, kw:kw + W, :].reshape(M, C)
                for kh in range(3) for kw in range(3)]    # kh-major, kw-minor
        patches = jnp.concatenate(taps, axis=-1)          # (M, 9C) f32
        # bf16 MXU inputs, f32 accumulation (review-sanctioned; no HIGHEST).
        return jnp.dot(patches.astype(jnp.bfloat16), w_ref[...],
                       preferred_element_type=jnp.float32)

    def bn(y, g, be):
        """Training-mode BN, single-pass stats, folded to one scale/shift FMA."""
        s = jnp.sum(y, axis=0, keepdims=True)
        ss = jnp.sum(y * y, axis=0, keepdims=True)
        mean = s * (1.0 / M)
        var = ss * (1.0 / M) - mean * mean                # biased variance
        scale = g * jax.lax.rsqrt(var + EPS)
        shift = be - mean * scale
        return y * scale + shift

    # conv1 -> bn1 -> relu        (conv bias omitted: cancelled by BN mean)
    h1 = jnp.maximum(bn(conv3x3(x, w1_ref), g1_ref[...], be1_ref[...]), 0.0)

    # conv2 -> bn2
    h2 = bn(conv3x3(h1.reshape(N, H, W, C), w2_ref), g2_ref[...], be2_ref[...])

    # residual add + relu
    out = jnp.maximum(h2 + x.reshape(M, C), 0.0)          # (M, C)

    # Lane-dense store: fold (M, C) -> (N*H, W*C) so the last dim is W*C=256
    # (unmasked vst) instead of C=32 (masked vst). Built with static slices +
    # lane-dim concat only.
    out3 = out.reshape(N * H, W, C)
    folded = jnp.concatenate([out3[:, j, :] for j in range(W)], axis=-1)
    o_ref[...] = folded.astype(o_ref.dtype)


@jax.jit
def resblock_forward(x_nchw, w1, b1, g1, be1, w2, b2, g2, be2):
    """x_nchw: (N, C, H, W) float32, like the PyTorch module's input.

    b1/b2 are accepted for interface parity with nn.Conv2d but are not used:
    a conv bias added before batch-statistic BN is exactly cancelled by the
    mean subtraction.
    """
    del b1, b2
    x = jnp.transpose(x_nchw, (0, 2, 3, 1)).astype(jnp.float32)   # NHWC
    N, H, W, C = x.shape

    # Fold HWIO (3,3,C,C) conv weights into im2col form (9C, C), bf16 once.
    w1m = w1.reshape(9 * C, C).astype(jnp.bfloat16)
    w2m = w2.reshape(9 * C, C).astype(jnp.bfloat16)

    vmem = pl.BlockSpec(memory_space=pltpu.MemorySpace.VMEM)
    out2d = pl.pallas_call(
        _resblock_kernel,
        out_shape=jax.ShapeDtypeStruct((N * H, W * C), jnp.float32),
        in_specs=[vmem] * 7,
        out_specs=vmem,
    )(x, w1m, g1, be1, w2m, g2, be2)

    out = out2d.reshape(N, H, W, C)
    return jnp.transpose(out, (0, 3, 1, 2))               # back to NCHW


def _reference_forward(x_nchw, w1, b1, g1, be1, w2, b2, g2, be2):
    """Pure-JAX high-precision reference matching the PyTorch forward."""
    x = jnp.transpose(x_nchw, (0, 2, 3, 1)).astype(jnp.float32)

    def conv(z, w, b):
        y = jax.lax.conv_general_dilated(
            z, w, (1, 1), 'SAME',
            dimension_numbers=('NHWC', 'HWIO', 'NHWC'),
            precision=jax.lax.Precision.HIGHEST)
        return y + b.reshape(1, 1, 1, -1)

    def bn(y, g, be):
        m = jnp.mean(y, axis=(0, 1, 2), keepdims=True)
        v = jnp.mean((y - m) ** 2, axis=(0, 1, 2), keepdims=True)
        return (y - m) * jax.lax.rsqrt(v + EPS) * g.reshape(1, 1, 1, -1) \
            + be.reshape(1, 1, 1, -1)

    h = jax.nn.relu(bn(conv(x, w1, b1), g1, be1))
    h = bn(conv(h, w2, b2), g2, be2)
    h = jax.nn.relu(h + x)
    return jnp.transpose(h, (0, 3, 1, 2))


if __name__ == "__main__":
    num_hidden = 32          # numHidden in the PyTorch module
    N, H, W = 2, 8, 8

    key = jax.random.PRNGKey(0)
    ks = jax.random.split(key, 10)

    # Deterministic synthetic parameters (conv weights generated directly in
    # HWIO = (3,3,Cin,Cout)).
    fan_in = num_hidden * 3 * 3
    w1 = jax.random.normal(ks[0], (3, 3, num_hidden, num_hidden), jnp.float32) / jnp.sqrt(fan_in)
    b1 = jax.random.normal(ks[1], (1, num_hidden), jnp.float32) * 0.1
    g1 = 1.0 + 0.1 * jax.random.normal(ks[2], (1, num_hidden), jnp.float32)
    be1 = 0.1 * jax.random.normal(ks[3], (1, num_hidden), jnp.float32)
    w2 = jax.random.normal(ks[4], (3, 3, num_hidden, num_hidden), jnp.float32) / jnp.sqrt(fan_in)
    b2 = jax.random.normal(ks[5], (1, num_hidden), jnp.float32) * 0.1
    g2 = 1.0 + 0.1 * jax.random.normal(ks[6], (1, num_hidden), jnp.float32)
    be2 = 0.1 * jax.random.normal(ks[7], (1, num_hidden), jnp.float32)

    x = jax.random.normal(ks[8], (N, num_hidden, H, W), jnp.float32)  # NCHW

    out = resblock_forward(x, w1, b1, g1, be1, w2, b2, g2, be2)
    out = jax.block_until_ready(out)

    ref = _reference_forward(x, w1, b1, g1, be1, w2, b2, g2, be2)
    assert out.shape == (N, num_hidden, H, W)
    # Tolerance widened vs fp32-HIGHEST baseline because the kernel now uses
    # bf16 MXU inputs (sanctioned by the perf review); reference is HIGHEST.
    assert jnp.allclose(out, ref, atol=3e-2, rtol=3e-2), \
        f"max abs err = {float(jnp.max(jnp.abs(out - ref)))}"

    print("KERNEL_OK")
</pallas_src>

<mosaic_0001>
module attributes {stable_mosaic.version = 11 : i64} {
  func.func @_resblock_kernel(%arg0: memref<2x8x8x32xf32, #tpu.memory_space<vmem>>, %arg1: memref<288x32xbf16, #tpu.memory_space<vmem>>, %arg2: memref<1x32xf32, #tpu.memory_space<vmem>>, %arg3: memref<1x32xf32, #tpu.memory_space<vmem>>, %arg4: memref<288x32xbf16, #tpu.memory_space<vmem>>, %arg5: memref<1x32xf32, #tpu.memory_space<vmem>>, %arg6: memref<1x32xf32, #tpu.memory_space<vmem>>, %arg7: memref<16x256xf32, #tpu.memory_space<vmem>>) attributes {dimension_semantics = [], scalar_prefetch = 0 : i64, scratch_operands = 0 : i64, tpu.core_type = #tpu.core_type<tc>} {
    %c0 = arith.constant 0 : index
    %c0_0 = arith.constant 0 : index
    %c0_1 = arith.constant 0 : index
    %c0_2 = arith.constant 0 : index
    %0 = vector.load %arg0[%c0, %c0_0, %c0_1, %c0_2] : memref<2x8x8x32xf32, #tpu.memory_space<vmem>>, vector<2x8x8x32xf32>
    %cst = arith.constant 0.000000e+00 : f32
    %1 = vector.broadcast %cst : f32 to vector<2x8x1x32xf32>
    %2 = tpu.concatenate %1, %0, %1 in 2 : vector<2x8x1x32xf32>, vector<2x8x8x32xf32>, vector<2x8x1x32xf32> -> vector<2x8x10x32xf32>
    %cst_3 = arith.constant 0.000000e+00 : f32
    %3 = vector.broadcast %cst_3 : f32 to vector<2x1x10x32xf32>
    %4 = tpu.concatenate %3, %2, %3 in 1 : vector<2x1x10x32xf32>, vector<2x8x10x32xf32>, vector<2x1x10x32xf32> -> vector<2x10x10x32xf32>
    %5 = vector.extract_strided_slice %4 {offsets = [0, 0, 0, 0], sizes = [2, 8, 8, 32], strides = [1, 1, 1, 1]} : vector<2x10x10x32xf32> to vector<2x8x8x32xf32>
    %6 = vector.shape_cast %5 : vector<2x8x8x32xf32> to vector<128x32xf32>
    %7 = vector.extract_strided_slice %4 {offsets = [0, 0, 1, 0], sizes = [2, 8, 8, 32], strides = [1, 1, 1, 1]} : vector<2x10x10x32xf32> to vector<2x8x8x32xf32>
    %8 = vector.shape_cast %7 : vector<2x8x8x32xf32> to vector<128x32xf32>
    %9 = vector.extract_strided_slice %4 {offsets = [0, 0, 2, 0], sizes = [2, 8, 8, 32], strides = [1, 1, 1, 1]} : vector<2x10x10x32xf32> to vector<2x8x8x32xf32>
    %10 = vector.shape_cast %9 : vector<2x8x8x32xf32> to vector<128x32xf32>
    %11 = vector.extract_strided_slice %4 {offsets = [0, 1, 0, 0], sizes = [2, 8, 8, 32], strides = [1, 1, 1, 1]} : vector<2x10x10x32xf32> to vector<2x8x8x32xf32>
    %12 = vector.shape_cast %11 : vector<2x8x8x32xf32> to vector<128x32xf32>
    %13 = vector.extract_strided_slice %4 {offsets = [0, 1, 1, 0], sizes = [2, 8, 8, 32], strides = [1, 1, 1, 1]} : vector<2x10x10x32xf32> to vector<2x8x8x32xf32>
    %14 = vector.shape_cast %13 : vector<2x8x8x32xf32> to vector<128x32xf32>
    %15 = vector.extract_strided_slice %4 {offsets = [0, 1, 2, 0], sizes = [2, 8, 8, 32], strides = [1, 1, 1, 1]} : vector<2x10x10x32xf32> to vector<2x8x8x32xf32>
    %16 = vector.shape_cast %15 : vector<2x8x8x32xf32> to vector<128x32xf32>
    %17 = vector.extract_strided_slice %4 {offsets = [0, 2, 0, 0], sizes = [2, 8, 8, 32], strides = [1, 1, 1, 1]} : vector<2x10x10x32xf32> to vector<2x8x8x32xf32>
    %18 = vector.shape_cast %17 : vector<2x8x8x32xf32> to vector<128x32xf32>
    %19 = vector.extract_strided_slice %4 {offsets = [0, 2, 1, 0], sizes = [2, 8, 8, 32], strides = [1, 1, 1, 1]} : vector<2x10x10x32xf32> to vector<2x8x8x32xf32>
    %20 = vector.shape_cast %19 : vector<2x8x8x32xf32> to vector<128x32xf32>
    %21 = vector.extract_strided_slice %4 {offsets = [0, 2, 2, 0], sizes = [2, 8, 8, 32], strides = [1, 1, 1, 1]} : vector<2x10x10x32xf32> to vector<2x8x8x32xf32>
    %22 = vector.shape_cast %21 : vector<2x8x8x32xf32> to vector<128x32xf32>
    %23 = tpu.concatenate %6, %8, %10, %12, %14, %16, %18, %20, %22 in 1 : vector<128x32xf32>, vector<128x32xf32>, vector<128x32xf32>, vector<128x32xf32>, vector<128x32xf32>, vector<128x32xf32>, vector<128x32xf32>, vector<128x32xf32>, vector<128x32xf32> -> vector<128x288xf32>
    %24 = arith.truncf %23 : vector<128x288xf32> to vector<128x288xbf16>
    %c0_4 = arith.constant 0 : index
    %c0_5 = arith.constant 0 : index
    %25 = vector.load %arg1[%c0_4, %c0_5] : memref<288x32xbf16, #tpu.memory_space<vmem>>, vector<288x32xbf16>
    %cst_6 = arith.constant dense<0.000000e+00> : vector<128x32xf32>
    %26 = tpu.matmul %24, %25, %cst_6 {dimension_numbers = #tpu.dot_dimension_numbers<[1], [0], [0], [1], [0, 0, 1, 1], [], []>} : vector<128x288xbf16>, vector<288x32xbf16>, vector<128x32xf32> -> vector<128x32xf32>
    %c0_7 = arith.constant 0 : index
    %c0_8 = arith.constant 0 : index
    %27 = vector.load %arg2[%c0_7, %c0_8] : memref<1x32xf32, #tpu.memory_space<vmem>>, vector<1x32xf32>
    %c0_9 = arith.constant 0 : index
    %c0_10 = arith.constant 0 : index
    %28 = vector.load %arg3[%c0_9, %c0_10] : memref<1x32xf32, #tpu.memory_space<vmem>>, vector<1x32xf32>
    %cst_11 = arith.constant dense<0.000000e+00> : vector<32xf32>
    %29 = vector.multi_reduction <add>, %26, %cst_11 [0] : vector<128x32xf32> to vector<32xf32>
    %30 = vector.shape_cast %29 : vector<32xf32> to vector<1x32xf32>
    %31 = arith.mulf %26, %26 : vector<128x32xf32>
    %cst_12 = arith.constant dense<0.000000e+00> : vector<32xf32>
    %32 = vector.multi_reduction <add>, %31, %cst_12 [0] : vector<128x32xf32> to vector<32xf32>
    %33 = vector.shape_cast %32 : vector<32xf32> to vector<1x32xf32>
    %cst_13 = arith.constant 7.812500e-03 : f32
    %34 = vector.broadcast %cst_13 : f32 to vector<1x32xf32>
    %35 = arith.mulf %30, %34 : vector<1x32xf32>
    %cst_14 = arith.constant 7.812500e-03 : f32
    %36 = vector.broadcast %cst_14 : f32 to vector<1x32xf32>
    %37 = arith.mulf %33, %36 : vector<1x32xf32>
    %38 = arith.mulf %35, %35 : vector<1x32xf32>
    %39 = arith.subf %37, %38 : vector<1x32xf32>
    %cst_15 = arith.constant 9.99999974E-6 : f32
    %40 = vector.broadcast %cst_15 : f32 to vector<1x32xf32>
    %41 = arith.addf %39, %40 : vector<1x32xf32>
    %42 = math.rsqrt %41 : vector<1x32xf32>
    %43 = arith.mulf %27, %42 : vector<1x32xf32>
    %44 = arith.mulf %35, %43 : vector<1x32xf32>
    %45 = arith.subf %28, %44 : vector<1x32xf32>
    %46 = vector.broadcast %43 : vector<1x32xf32> to vector<128x32xf32>
    %47 = arith.mulf %26, %46 : vector<128x32xf32>
    %48 = vector.broadcast %45 : vector<1x32xf32> to vector<128x32xf32>
    %49 = arith.addf %47, %48 : vector<128x32xf32>
    %cst_16 = arith.constant 0.000000e+00 : f32
    %50 = vector.broadcast %cst_16 : f32 to vector<128x32xf32>
    %51 = arith.maximumf %49, %50 : vector<128x32xf32>
    %52 = vector.shape_cast %51 : vector<128x32xf32> to vector<2x8x8x32xf32>
    %cst_17 = arith.constant 0.000000e+00 : f32
    %53 = vector.broadcast %cst_17 : f32 to vector<2x8x1x32xf32>
    %54 = tpu.concatenate %53, %52, %53 in 2 : vector<2x8x1x32xf32>, vector<2x8x8x32xf32>, vector<2x8x1x32xf32> -> vector<2x8x10x32xf32>
    %cst_18 = arith.constant 0.000000e+00 : f32
    %55 = vector.broadcast %cst_18 : f32 to vector<2x1x10x32xf32>
    %56 = tpu.concatenate %55, %54, %55 in 1 : vector<2x1x10x32xf32>, vector<2x8x10x32xf32>, vector<2x1x10x32xf32> -> vector<2x10x10x32xf32>
    %57 = vector.extract_strided_slice %56 {offsets = [0, 0, 0, 0], sizes = [2, 8, 8, 32], strides = [1, 1, 1, 1]} : vector<2x10x10x32xf32> to vector<2x8x8x32xf32>
    %58 = vector.shape_cast %57 : vector<2x8x8x32xf32> to vector<128x32xf32>
    %59 = vector.extract_strided_slice %56 {offsets = [0, 0, 1, 0], sizes = [2, 8, 8, 32], strides = [1, 1, 1, 1]} : vector<2x10x10x32xf32> to vector<2x8x8x32xf32>
    %60 = vector.shape_cast %59 : vector<2x8x8x32xf32> to vector<128x32xf32>
    %61 = vector.extract_strided_slice %56 {offsets = [0, 0, 2, 0], sizes = [2, 8, 8, 32], strides = [1, 1, 1, 1]} : vector<2x10x10x32xf32> to vector<2x8x8x32xf32>
    %62 = vector.shape_cast %61 : vector<2x8x8x32xf32> to vector<128x32xf32>
    %63 = vector.extract_strided_slice %56 {offsets = [0, 1, 0, 0], sizes = [2, 8, 8, 32], strides = [1, 1, 1, 1]} : vector<2x10x10x32xf32> to vector<2x8x8x32xf32>
    %64 = vector.shape_cast %63 : vector<2x8x8x32xf32> to vector<128x32xf32>
    %65 = vector.extract_strided_slice %56 {offsets = [0, 1, 1, 0], sizes = [2, 8, 8, 32], strides = [1, 1, 1, 1]} : vector<2x10x10x32xf32> to vector<2x8x8x32xf32>
    %66 = vector.shape_cast %65 : vector<2x8x8x32xf32> to vector<128x32xf32>
    %67 = vector.extract_strided_slice %56 {offsets = [0, 1, 2, 0], sizes = [2, 8, 8, 32], strides = [1, 1, 1, 1]} : vector<2x10x10x32xf32> to vector<2x8x8x32xf32>
    %68 = vector.shape_cast %67 : vector<2x8x8x32xf32> to vector<128x32xf32>
    %69 = vector.extract_strided_slice %56 {offsets = [0, 2, 0, 0], sizes = [2, 8, 8, 32], strides = [1, 1, 1, 1]} : vector<2x10x10x32xf32> to vector<2x8x8x32xf32>
    %70 = vector.shape_cast %69 : vector<2x8x8x32xf32> to vector<128x32xf32>
    %71 = vector.extract_strided_slice %56 {offsets = [0, 2, 1, 0], sizes = [2, 8, 8, 32], strides = [1, 1, 1, 1]} : vector<2x10x10x32xf32> to vector<2x8x8x32xf32>
    %72 = vector.shape_cast %71 : vector<2x8x8x32xf32> to vector<128x32xf32>
    %73 = vector.extract_strided_slice %56 {offsets = [0, 2, 2, 0], sizes = [2, 8, 8, 32], strides = [1, 1, 1, 1]} : vector<2x10x10x32xf32> to vector<2x8x8x32xf32>
    %74 = vector.shape_cast %73 : vector<2x8x8x32xf32> to vector<128x32xf32>
    %75 = tpu.concatenate %58, %60, %62, %64, %66, %68, %70, %72, %74 in 1 : vector<128x32xf32>, vector<128x32xf32>, vector<128x32xf32>, vector<128x32xf32>, vector<128x32xf32>, vector<128x32xf32>, vector<128x32xf32>, vector<128x32xf32>, vector<128x32xf32> -> vector<128x288xf32>
    %76 = arith.truncf %75 : vector<128x288xf32> to vector<128x288xbf16>
    %c0_19 = arith.constant 0 : index
    %c0_20 = arith.constant 0 : index
    %77 = vector.load %arg4[%c0_19, %c0_20] : memref<288x32xbf16, #tpu.memory_space<vmem>>, vector<288x32xbf16>
    %cst_21 = arith.constant dense<0.000000e+00> : vector<128x32xf32>
    %78 = tpu.matmul %76, %77, %cst_21 {dimension_numbers = #tpu.dot_dimension_numbers<[1], [0], [0], [1], [0, 0, 1, 1], [], []>} : vector<128x288xbf16>, vector<288x32xbf16>, vector<128x32xf32> -> vector<128x32xf32>
    %c0_22 = arith.constant 0 : index
    %c0_23 = arith.constant 0 : index
    %79 = vector.load %arg5[%c0_22, %c0_23] : memref<1x32xf32, #tpu.memory_space<vmem>>, vector<1x32xf32>
    %c0_24 = arith.constant 0 : index
    %c0_25 = arith.constant 0 : index
    %80 = vector.load %arg6[%c0_24, %c0_25] : memref<1x32xf32, #tpu.memory_space<vmem>>, vector<1x32xf32>
    %cst_26 = arith.constant dense<0.000000e+00> : vector<32xf32>
    %81 = vector.multi_reduction <add>, %78, %cst_26 [0] : vector<128x32xf32> to vector<32xf32>
    %82 = vector.shape_cast %81 : vector<32xf32> to vector<1x32xf32>
    %83 = arith.mulf %78, %78 : vector<128x32xf32>
    %cst_27 = arith.constant dense<0.000000e+00> : vector<32xf32>
    %84 = vector.multi_reduction <add>, %83, %cst_27 [0] : vector<128x32xf32> to vector<32xf32>
    %85 = vector.shape_cast %84 : vector<32xf32> to vector<1x32xf32>
    %cst_28 = arith.constant 7.812500e-03 : f32
    %86 = vector.broadcast %cst_28 : f32 to vector<1x32xf32>
    %87 = arith.mulf %82, %86 : vector<1x32xf32>
    %cst_29 = arith.constant 7.812500e-03 : f32
    %88 = vector.broadcast %cst_29 : f32 to vector<1x32xf32>
    %89 = arith.mulf %85, %88 : vector<1x32xf32>
    %90 = arith.mulf %87, %87 : vector<1x32xf32>
    %91 = arith.subf %89, %90 : vector<1x32xf32>
    %cst_30 = arith.constant 9.99999974E-6 : f32
    %92 = vector.broadcast %cst_30 : f32 to vector<1x32xf32>
    %93 = arith.addf %91, %92 : vector<1x32xf32>
    %94 = math.rsqrt %93 : vector<1x32xf32>
    %95 = arith.mulf %79, %94 : vector<1x32xf32>
    %96 = arith.mulf %87, %95 : vector<1x32xf32>
    %97 = arith.subf %80, %96 : vector<1x32xf32>
    %98 = vector.broadcast %95 : vector<1x32xf32> to vector<128x32xf32>
    %99 = arith.mulf %78, %98 : vector<128x32xf32>
    %100 = vector.broadcast %97 : vector<1x32xf32> to vector<128x32xf32>
    %101 = arith.addf %99, %100 : vector<128x32xf32>
    %102 = vector.shape_cast %0 : vector<2x8x8x32xf32> to vector<128x32xf32>
    %103 = arith.addf %101, %102 : vector<128x32xf32>
    %cst_31 = arith.constant 0.000000e+00 : f32
    %104 = vector.broadcast %cst_31 : f32 to vector<128x32xf32>
    %105 = arith.maximumf %103, %104 : vector<128x32xf32>
    %106 = vector.shape_cast %105 : vector<128x32xf32> to vector<16x8x32xf32>
    %107 = vector.extract_strided_slice %106 {offsets = [0, 0, 0], sizes = [16, 1, 32], strides = [1, 1, 1]} : vector<16x8x32xf32> to vector<16x1x32xf32>
    %108 = vector.shape_cast %107 : vector<16x1x32xf32> to vector<16x32xf32>
    %109 = vector.extract_strided_slice %106 {offsets = [0, 1, 0], sizes = [16, 1, 32], strides = [1, 1, 1]} : vector<16x8x32xf32> to vector<16x1x32xf32>
    %110 = vector.shape_cast %109 : vector<16x1x32xf32> to vector<16x32xf32>
    %111 = vector.extract_strided_slice %106 {offsets = [0, 2, 0], sizes = [16, 1, 32], strides = [1, 1, 1]} : vector<16x8x32xf32> to vector<16x1x32xf32>
    %112 = vector.shape_cast %111 : vector<16x1x32xf32> to vector<16x32xf32>
    %113 = vector.extract_strided_slice %106 {offsets = [0, 3, 0], sizes = [16, 1, 32], strides = [1, 1, 1]} : vector<16x8x32xf32> to vector<16x1x32xf32>
    %114 = vector.shape_cast %113 : vector<16x1x32xf32> to vector<16x32xf32>
    %115 = vector.extract_strided_slice %106 {offsets = [0, 4, 0], sizes = [16, 1, 32], strides = [1, 1, 1]} : vector<16x8x32xf32> to vector<16x1x32xf32>
    %116 = vector.shape_cast %115 : vector<16x1x32xf32> to vector<16x32xf32>
    %117 = vector.extract_strided_slice %106 {offsets = [0, 5, 0], sizes = [16, 1, 32], strides = [1, 1, 1]} : vector<16x8x32xf32> to vector<16x1x32xf32>
    %118 = vector.shape_cast %117 : vector<16x1x32xf32> to vector<16x32xf32>
    %119 = vector.extract_strided_slice %106 {offsets = [0, 6, 0], sizes = [16, 1, 32], strides = [1, 1, 1]} : vector<16x8x32xf32> to vector<16x1x32xf32>
    %120 = vector.shape_cast %119 : vector<16x1x32xf32> to vector<16x32xf32>
    %121 = vector.extract_strided_slice %106 {offsets = [0, 7, 0], sizes = [16, 1, 32], strides = [1, 1, 1]} : vector<16x8x32xf32> to vector<16x1x32xf32>
    %122 = vector.shape_cast %121 : vector<16x1x32xf32> to vector<16x32xf32>
    %123 = tpu.concatenate %108, %110, %112, %114, %116, %118, %120, %122 in 1 : vector<16x32xf32>, vector<16x32xf32>, vector<16x32xf32>, vector<16x32xf32>, vector<16x32xf32>, vector<16x32xf32>, vector<16x32xf32>, vector<16x32xf32> -> vector<16x256xf32>
    %c0_32 = arith.constant 0 : index
    %c0_33 = arith.constant 0 : index
    %124 = vector.load %arg7[%c0_32, %c0_33] : memref<16x256xf32, #tpu.memory_space<vmem>>, vector<16x256xf32>
    tpu.vector_store %arg7[%c0_32, %c0_33], %123 {strides = array<i32>} : memref<16x256xf32, #tpu.memory_space<vmem>>, vector<16x256xf32>,
    return
  }
}

</mosaic_0001>

<bundles_post_ra>
// kernel: resblock_forward.1
= control target key start
LH: loop header
LB: loop body
LE: loop exit
PB: predicated region body
PF: predicated region fallthrough
CT: control target
= control target key end

     0   :  { %vm91_vm0 = vcmask 1040384   ;;  %vm198_vm1 = vcmask 1045504   ;;  %v3420_v7 = vmov 0.0   ;;  %vm153_vm2 = vcmask 1046528   ;;  %s3421_s11 = smov 64   ;;  %s3422_s22 = smov 32   ;;  %s5347_s0 = inlined_call_operand.vmem [shape: f32[2,8,8,32], index: 0, kind: input, shape index: {}]   ;;  %s5348_s1 = inlined_call_operand.vmem [shape: bf16[288,32], index: 1, kind: input, shape index: {}]   ;;  %s5349_s4 = inlined_call_operand.vmem [shape: bf16[288,32], index: 4, kind: input, shape index: {}]   ;;  %s5350_s2 = inlined_call_operand.vmem [shape: f32[1,32], index: 2, kind: input, shape index: {}]   ;;  %s5351_s3 = inlined_call_operand.vmem [shape: f32[1,32], index: 3, kind: input, shape index: {}]   ;;  %s5352_s5 = inlined_call_operand.vmem [shape: f32[1,32], index: 5, kind: input, shape index: {}]   ;;  %s5353_s6 = inlined_call_operand.vmem [shape: f32[1,32], index: 6, kind: input, shape index: {}]   ;;  %s5354_s7 = inlined_call_operand.vmem [shape: f32[16,256], index: 7, kind: output, shape index: {}]  }
   0x1   :  { %v28_v0 = vld [vmem:[%s5347_s0 + $0x8] sm:$0xff]  ;;  %v29_v1 = vld [vmem:[%s5347_s0 + $0x10] sm:$0xff]  ;;  %v27_v2 = vld [vmem:[%s5347_s0] sm:$0xff]  ;;  %v3477_v8 = vrot.slane %v3420_v7, 2  ;;  %v3480_v9 = vrot.slane %v3420_v7, 1  ;;  %s3423_s23 = smov 96  }
   0x2   :  { %v60_v3 = vrot.slane %v28_v0, 7  ;;  %v61_v4 = vrot.slane %v29_v1, 7  ;;  %v59_v5 = vrot.slane %v27_v2, 7  ;;  %v30_v6 = vld [vmem:[%s5347_s0 + $0x18] sm:$0xff]  ;;  %v31_v23 = vld [vmem:[%s5347_s0 + $0x20] sm:$0xff]  ;;  %v32_v39 = vld [vmem:[%s5347_s0 + $0x28] sm:$0xff] }
   0x3   :  { %v62_v10 = vrot.slane %v30_v6, 7  ;;  %v3362_v28 = vld [vmem:[%s5348_s1 + $0x78] sm:$0xff]   ;;  %v3364_v40 = vld [vmem:[%s5348_s1 + $0x70] sm:$0xff]   ;;  %v63_v45 = vrot.slane %v31_v23, 7  ;;  %v3366_v50 = vld [vmem:[%s5348_s1 + $0x68] sm:$0xff]   ;;  %v64_v52 = vrot.slane %v32_v39, 7 }
   0x4   :  { %v3483_v11 = vsel %vm91_vm0, 0.0, %v60_v3  ;;  %v3486_v12 = vsel %vm91_vm0, 0.0, %v61_v4  ;;  %v3489_v13 = vsel %vm91_vm0, 0.0, %v59_v5  ;;  %v108_v14 = vsel %vm91_vm0, %v59_v5, 0.0  ;;  %2726 = vmatprep.subr.bf16.mxu0 %v3362_v28  ;;  %v3363_v35 = vld [vmem:[%s5348_s1 + $0x38] sm:$0xff]   ;;  %v3365_v41 = vld [vmem:[%s5348_s1 + $0x30] sm:$0xff]  }
   0x5   :  { %v2922_v15 = vpack.i.bf16 %v3486_v12, %v3483_v11  ;;  %v109_v16 = vsel %vm91_vm0, %v60_v3, 0.0  ;;  %v157_v17 = vrot.slane %v108_v14, 1  ;;  %v201_v18 = vrot.slane %v3489_v13, 2  ;;  %2727 = vmatpush3.bf16.msra.mxu0 %v3363_v35  ;;  %v3367_v57 = vld [vmem:[%s5348_s1 + $0x28] sm:$0xff]   ;;  %v3368_v58 = vld [vmem:[%s5348_s1 + $0x60] sm:$0xff]   ;;  %v33_v6 = vld [vmem:[%s5347_s0 + $0x30] sm:$0xff] }
   0x6   :  { %v160_v19 = vrot.slane %v109_v16, 1  ;;  %v202_v20 = vrot.slane %v108_v14, 2  ;;  %v204_v21 = vrot.slane %v3483_v11, 2  ;;  %v205_v22 = vrot.slane %v109_v16, 2  ;;  %2728 = vmatprep.subr.bf16.mxu0 %v3364_v40  ;;  %v3369_v2 = vld [vmem:[%s5348_s1 + $0x20] sm:$0xff]   ;;  %v34_v23 = vld [vmem:[%s5347_s0 + $0x38] sm:$0xff] }
   0x7   :  { %2923 = vrot.lane.b32.xlu1 %v2922_v15, %s3421_s11  ;;  %v2927_v24 = vpack.i.bf16 %v3483_v11, %v3489_v13  ;;  %v156_v25 = vrot.slane %v3489_v13, 1  ;;  %v110_v26 = vsel %vm91_vm0, %v61_v4, 0.0  ;;  %v159_v27 = vrot.slane %v3483_v11, 1  ;;  %v3370_v4 = vld [vmem:[%s5348_s1 + $0x58] sm:$0xff]   ;;  %v3373_v28 = vld [vmem:[%s5348_s1 + $0x10] sm:$0xff]   ;;  %v3379_v35 = vld [vmem:[%s5348_s1 + $0x80] sm:$0xff]  }
   0x8   :  { %v203_v29 = vsel %vm198_vm1, %v201_v18, %v202_v20  ;;  %v3511_v30 = vsel %vm198_vm1, %v204_v21, %v205_v22  ;;  %v162_v31 = vrot.slane %v3486_v12, 1  ;;  %v163_v32 = vrot.slane %v110_v26, 1  ;;  %v3371_v20 = vld [vmem:[%s5348_s1 + $0x18] sm:$0xff]   ;;  %v3372_v22 = vld [vmem:[%s5348_s1 + $0x50] sm:$0xff]  }
   0x9   :  { %v2932_v33 = vpack.i.bf16 %v3511_v30, %v203_v29  ;;  %v3516_v34 = vsel %vm153_vm2, %v156_v25, %v157_v17  ;;  %v2942_v36 = vpack.i.bf16 %v203_v29, %v3477_v8  ;;  %v3523_v37 = vsel %vm91_vm0, 0.0, %v62_v10  ;;  %2729 = vmatpush3.bf16.msra.mxu0 %v3365_v41 }
   0xa   :  { %v111_v38 = vsel %vm91_vm0, %v62_v10, 0.0  ;;  %v2937_v42 = vpack.i.bf16 %v3516_v34, %v3480_v9  ;;  %v3540_v43 = vsel %vm153_vm2, %v159_v27, %v160_v19  ;;  %v3543_v44 = vsel %vm153_vm2, %v162_v31, %v163_v32  ;;  %2730 = vmatprep.subr.bf16.mxu0 %v3366_v50 }
   0xb   :  { %2933 = vrot.lane.b32.xlu0 %v2932_v33, %s3422_s22  ;;  %2928 = vrot.lane.b32.xlu1 %v2927_v24, %s3423_s23  ;;  %v207_v46 = vrot.slane %v3486_v12, 2  ;;  %v208_v47 = vrot.slane %v110_v26, 2  ;;  %v210_v48 = vrot.slane %v3523_v37, 2  ;;  %v211_v49 = vrot.slane %v111_v38, 2  ;;  %v3376_v24 = vld [vmem:[%s5348_s1 + $0x88] sm:$0xff]  }
   0xc   :  { %v2947_v51 = vpack.i.bf16 %v3543_v44, %v3540_v43  ;;  %v3561_v55 = vsel %vm91_vm0, 0.0, %v63_v45  ;;  %v112_v56 = vsel %vm91_vm0, %v63_v45, 0.0  ;;  %v165_v59 = vrot.slane %v3523_v37, 1  ;;  %2874 = vmatprep.subr.bf16.mxu1 %v3376_v24  ;;  %v3374_v33 = vld [vmem:[%s5348_s1 + $0x48] sm:$0xff]  }
   0xd   :  { %v3555_v53 = vsel %vm198_vm1, %v207_v46, %v208_v47  ;;  %v3558_v54 = vsel %vm198_vm1, %v210_v48, %v211_v49  ;;  %v166_v60 = vrot.slane %v111_v38, 1  ;;  %v168_v63 = vrot.slane %v3561_v55, 1  ;;  %2731 = vmatpush3.bf16.msra.mxu0 %v3367_v57  ;;  %2875 = vmatpush3.bf16.msra.mxu1 %v3376_v24  ;;  %v3375_v45 = vld [vmem:[%s5348_s1 + $0x8] sm:$0xff]   ;;  %v35_v48 = vld [vmem:[%s5347_s0 + $0x40] sm:$0xff] }
   0xe   :  { %v2952_v61 = vpack.i.bf16 %v3558_v54, %v3555_v53  ;;  %v2967_v62 = vpack.i.bf16 %v3555_v53, %v3511_v30  ;;  %v169_v0 = vrot.slane %v112_v56, 1  ;;  %v3579_v1 = vsel %vm91_vm0, 0.0, %v64_v52  ;;  %2732 = vmatprep.subr.bf16.mxu0 %v3368_v58  ;;  %2876 = vmatprep.subr.bf16.mxu1 %v3379_v35  ;;  %v3377_v49 = vld [vmem:[%s5348_s1 + $0x40] sm:$0xff]  }
   0xf   :  { %2938 = vrot.lane.b32.xlu0 %v2937_v42, %s3422_s22  ;;  %2943 = vrot.lane.b32.xlu1 %v2942_v36, %s3421_s11  ;;  %v113_v3 = vsel %vm91_vm0, %v64_v52, 0.0  ;;  %v213_v5 = vrot.slane %v3561_v55, 2  ;;  %v2962_v10 = vpack.i.bf16 %v3561_v55, %v3523_v37  ;;  %v2977_v14 = vpack.i.bf16 %v3523_v37, %v3486_v12 }
  0x10   :  { %v214_v15 = vrot.slane %v112_v56, 2  ;;  %v216_v16 = vrot.slane %v3579_v1, 2  ;;  %v3600_v17 = vsel %vm153_vm2, %v165_v59, %v166_v60  ;;  %v3603_v18 = vsel %vm153_vm2, %v168_v63, %v169_v0  ;;  %v3378_v63 = vld [vmem:[%s5348_s1] sm:$0xff]  }
  0x11   :  { %v217_v19 = vrot.slane %v113_v3, 2  ;;  %2733 = vmatpush3.bf16.msra.mxu0 %v3369_v2  ;;  %v65_v21 = vrot.slane %v33_v6, 7  ;;  %v2972_v25 = vpack.i.bf16 %v3603_v18, %v3600_v17  ;;  %v66_v32 = vrot.slane %v34_v23, 7  ;;  %2877 = vmatpush3.bf16.msra.mxu1 %v3379_v35  ;;  %v36_v2 = vld [vmem:[%s5347_s0 + $0x48] sm:$0xff] }
  0x12   :  { %2734 = vmatprep.subr.bf16.mxu0 %v3370_v4  ;;  %v3622_v26 = vsel %vm198_vm1, %v213_v5, %v214_v15  ;;  %v171_v39 = vrot.slane %v3579_v1, 1  ;;  %v172_v40 = vrot.slane %v113_v3, 1  ;;  %v3007_v50 = vpack.i.bf16 %v3579_v1, %v3561_v55 }
  0x13   :  { %2948 = vrot.lane.b32.xlu0 %v2947_v51, %s3423_s23  ;;  %2958 = vrot.lane.b32.xlu1 %v2947_v51, %s3422_s22  ;;  %v3625_v27 = vsel %vm198_vm1, %v216_v16, %v217_v19  ;;  %v3631_v29 = vsel %vm91_vm0, 0.0, %v65_v21  ;;  %v114_v31 = vsel %vm91_vm0, %v65_v21, 0.0  ;;  %v2997_v38 = vpack.i.bf16 %v3622_v26, %v3558_v54  ;;  %v37_v51 = vld [vmem:[%s5347_s0 + $0x50] sm:$0xff] }
  0x14   :  { %v2982_v36 = vpack.i.bf16 %v3625_v27, %v3622_v26  ;;  %v174_v41 = vrot.slane %v3631_v29, 1  ;;  %v175_v42 = vrot.slane %v114_v31, 1  ;;  %v3652_v46 = vsel %vm91_vm0, 0.0, %v66_v32 }
  0x15   :  { %2735 = vmatpush3.bf16.msra.mxu0 %v3371_v20  ;;  %v115_v47 = vsel %vm91_vm0, %v66_v32, 0.0  ;;  %v2992_v52 = vpack.i.bf16 %v3631_v29, %v3579_v1  ;;  %v3671_v56 = vsel %vm153_vm2, %v171_v39, %v172_v40  ;;  %v219_v57 = vrot.slane %v3631_v29, 2 }
  0x16   :  { %2736 = vmatprep.subr.bf16.mxu0 %v3372_v22  ;;  %v220_v58 = vrot.slane %v114_v31, 2  ;;  %v3675_v59 = vsel %vm153_vm2, %v174_v41, %v175_v42  ;;  %v269_v60 = vrot.slane %v3652_v46, 2  ;;  %v69_v0 = vrot.slane %v37_v51, 7 }
  0x17   :  { %2953 = vrot.lane.b32.xlu0 %v2952_v61, %s3422_s22  ;;  %2968 = vrot.lane.b32.xlu1 %v2967_v62, %s3421_s11  ;;  %v270_v61 = vrot.slane %v115_v47, 2  ;;  %v67_v62 = vrot.slane %v35_v48, 7  ;;  %v3002_v3 = vpack.i.bf16 %v3675_v59, %v3671_v56  ;;  %v68_v16 = vrot.slane %v36_v2, 7 }
  0x18   :  { %v221_v4 = vsel %vm198_vm1, %v219_v57, %v220_v58  ;;  %v3700_v15 = vsel %vm91_vm0, %v69_v0, 0.0  ;;  %v247_v20 = vrot.slane %v3652_v46, 1  ;;  %v248_v22 = vrot.slane %v115_v47, 1 }
  0x19   :  { %2737 = vmatpush3.bf16.msra.mxu0 %v3373_v28  ;;  %v3690_v5 = vsel %vm198_vm1, %v269_v60, %v270_v61  ;;  %v3693_v6 = vsel %vm91_vm0, 0.0, %v67_v62  ;;  %v3027_v19 = vpack.i.bf16 %v221_v4, %v3625_v27  ;;  %v229_v28 = vrot.slane %v3700_v15, 2 }
  0x1a   :  { %2738 = vmatprep.subr.bf16.mxu0 %v3374_v33  ;;  %v3012_v21 = vpack.i.bf16 %v3690_v5, %v221_v4  ;;  %v177_v23 = vrot.slane %v3693_v6, 1  ;;  %v3711_v31 = vsel %vm91_vm0, 0.0, %v68_v16  ;;  %v117_v32 = vsel %vm91_vm0, %v68_v16, 0.0  ;;  %v38_v33 = vld [vmem:[%s5347_s0 + $0x58] sm:$0xff] }
  0x1b   :  { %2963 = vrot.lane.b32.xlu0 %v2962_v10, %s3421_s11  ;;  %2978 = vrot.lane.b32.xlu1 %v2977_v14, %s3423_s23  ;;  %v116_v10 = vsel %vm91_vm0, %v67_v62, 0.0  ;;  %v3697_v14 = vsel %vm91_vm0, 0.0, %v69_v0  ;;  %v3022_v35 = vpack.i.bf16 %v3420_v7, %v3652_v46  ;;  %v3727_v39 = vsel %vm153_vm2, %v247_v20, %v248_v22 }
  0x1c   :  { %v178_v24 = vrot.slane %v116_v10, 1  ;;  %v222_v41 = vrot.slane %v3693_v6, 2  ;;  %v223_v7 = vrot.slane %v116_v10, 2  ;;  %v70_v47 = vrot.slane %v38_v33, 7 }
  0x1d   :  { %2739 = vmatpush3.bf16.msra.mxu0 %v3375_v45  ;;  %v225_v45 = vrot.slane %v3711_v31, 2  ;;  %vm566_vm3 = vcmask 261120   ;;  %v671_v57 = vpack.c.bf16 %v221_v4, %v3625_v27  ;;  %v180_v27 = vrot.slane %v3711_v31, 1 }
  0x1e   :  { %2740 = vmatprep.subr.bf16.mxu0 %v3377_v49  ;;  %v3730_v40 = vsel %vm153_vm2, %v177_v23, %v178_v24  ;;  %v3032_v49 = vpack.i.bf16 %v3480_v9, %v3727_v39  ;;  %v224_v58 = vsel %vm198_vm1, %v222_v41, %v223_v7  ;;  %v181_v61 = vrot.slane %v117_v32, 1 }
  0x1f   :  { %2973 = vrot.lane.b32.xlu0 %v2972_v25, %s3423_s23  ;;  %2988 = vrot.lane.b32.xlu1 %v2972_v25, %s3422_s22  ;;  %v228_v25 = vrot.slane %v3697_v14, 2  ;;  %v183_v62 = vrot.slane %v3697_v14, 1  ;;  %v674_v4 = vpack.c.bf16 %v3477_v8, %v3690_v5  ;;  %v119_v10 = vsel %vm91_vm0, %v70_v47, 0.0 }
  0x20   :  { %v3052_v16 = vpack.i.bf16 %v3697_v14, %v3711_v31  ;;  %v3789_v20 = vsel %vm153_vm2, %v180_v27, %v181_v61  ;;  %v232_v24 = vrot.slane %v119_v10, 2  ;;  %vm582_vm4 = vcmask 523264  }
  0x21   :  { %2741 = vmatpush3.bf16.msra.mxu0 %v3378_v63  ;;  %v3734_v42 = vsel %vm198_vm1, %v228_v25, %v229_v28  ;;  %v184_v63 = vrot.slane %v3700_v15, 1  ;;  %v41_v15 = vld [vmem:[%s5347_s0 + $0x70] sm:$0xff]  ;;  %vm598_vm5 = vcmask 785408   ;;  %vm2384_vm6 = vcmask 1041409  }
  0x22   :  { %v3047_v51 = vpack.i.bf16 %v3734_v42, %v3730_v40  ;;  %v73_v28 = vrot.slane %v41_v15, 7  ;;  %vm2387_vm7 = vcmask 1042434   ;;  %vm2390_vm8 = vcmask 1043459  }
  0x23   :  { %2983 = vrot.lane.b32.xlu0 %v2982_v36, %s3422_s22  ;;  %2998 = vrot.lane.b32.xlu1 %v2997_v38, %s3421_s11  ;;  %v3037_v36 = vpack.i.bf16 %v3652_v46, %v3631_v29  ;;  %v39_v38 = vld [vmem:[%s5347_s0 + $0x60] sm:$0xff]  ;;  %v226_v46 = vrot.slane %v117_v32, 2  ;;  %v3793_v22 = vsel %vm153_vm2, %v183_v62, %v184_v63  ;;  %vm2393_vm9 = vcmask 1044484  }
  0x24   :  { %v71_v48 = vrot.slane %v39_v38, 7  ;;  %v3062_v32 = vpack.i.bf16 %v3793_v22, %v3789_v20  ;;  %v3810_v38 = vsel %vm91_vm0, 0.0, %v73_v28  ;;  %v122_v41 = vsel %vm91_vm0, %v73_v28, 0.0 }
  0x25   :  { %v3750_v9 = vsel %vm198_vm1, %v225_v45, %v226_v46  ;;  %vm2396_vm10 = vcmask 1045509   ;;  %vm2399_vm11 = vcmask 1046534   ;;  %vm2402_vm12 = vcmask 1047559  }
  0x26   :  { %v3760_v60 = vsel %vm91_vm0, %v71_v48, 0.0  ;;  %v677_v25 = vpack.c.bf16 %v3734_v42, %v3750_v9 }
  0x27   :  { %2993 = vrot.lane.b32.xlu0 %v2992_v52, %s3421_s11  ;;  %3008 = vrot.lane.b32.xlu1 %v3007_v50, %s3423_s23  ;;  %v665_v50 = vpack.c.bf16 %v3555_v53, %v3511_v30  ;;  %v668_v52 = vpack.c.bf16 %v3622_v26, %v3558_v54  ;;  %v3753_v30 = vsel %vm91_vm0, 0.0, %v70_v47  ;;  %v3757_v53 = vsel %vm91_vm0, 0.0, %v71_v48 }
  0x28   :  { %v3042_v54 = vpack.i.bf16 %v3750_v9, %v224_v58  ;;  %v3057_v26 = vpack.i.bf16 %v3753_v30, %v224_v58  ;;  %v234_v0 = vrot.slane %v3757_v53, 2  ;;  %v235_v2 = vrot.slane %v3760_v60, 2 }
  0x29   :  { %2878 = vmatprep.mubr.msk.bf16.mxu1 %vm566_vm3, %v665_v50  ;;  %v231_v5 = vrot.slane %v3753_v30, 2  ;;  %v186_v47 = vrot.slane %v3753_v30, 1  ;;  %v187_v48 = vrot.slane %v119_v10, 1  ;;  %v190_v50 = vrot.slane %v3760_v60, 1 }
  0x2a   :  { %2879 = vmatmul.mubr.msk.bf16.vlgmr.msra.gmra.mxu1 %vm566_vm3, %v668_v52  ;;  %v236_v23 = vsel %vm198_vm1, %v234_v0, %v235_v2  ;;  %v241_v52 = vrot.slane %v122_v41, 2  ;;  %v3082_v58 = vpack.i.bf16 %v3750_v9, %v3757_v53  ;;  %v3097_v60 = vpack.i.bf16 %v3753_v30, %v3697_v14 }
  0x2b   :  { %3003 = vrot.lane.b32.xlu0 %v3002_v3, %s3423_s23  ;;  %3018 = vrot.lane.b32.xlu1 %v3002_v3, %s3422_s22  ;;  %v40_v3 = vld [vmem:[%s5347_s0 + $0x68] sm:$0xff]  ;;  %v3077_v33 = vpack.i.bf16 %v236_v23, %v3793_v22  ;;  %v3835_v61 = vsel %vm153_vm2, %v186_v47, %v187_v48 }
  0x2c   :  { %2882 = vmatprep.mubr.msk.bf16.mxu1 %vm566_vm3, %v671_v57 }
  0x2f   :  { %3013 = vrot.lane.b32.xlu0 %v3012_v21, %s3422_s22  ;;  %3028 = vrot.lane.b32.xlu1 %v3027_v19, %s3421_s11  ;;  %v3067_v19 = vpack.i.bf16 %v3711_v31, %v3693_v6  ;;  %v72_v21 = vrot.slane %v40_v3, 7 }
  0x31   :  { %v121_v57 = vsel %vm91_vm0, %v72_v21, 0.0 }
  0x32   :  { %2883 = vmatmul.mubr.msk.bf16.gmra.mxu1 %vm566_vm3, %v674_v4 }
  0x33   :  { %3023 = vrot.lane.b32.xlu0 %v3022_v35, %s3421_s11  ;;  %3038 = vrot.lane.b32.xlu1 %v3037_v36, %s3423_s23  ;;  %v3806_v35 = vsel %vm91_vm0, 0.0, %v72_v21  ;;  %v233_v36 = vsel %vm198_vm1, %v231_v5, %v232_v24  ;;  %v195_v24 = vrot.slane %v3810_v38, 1 }
  0x34   :  { %2886 = vmatprep.mubr.msk.bf16.mxu1 %vm566_vm3, %v677_v25  ;;  %v680_v7 = vpack.c.bf16 %v236_v23, %v233_v36  ;;  %v3087_v45 = vpack.i.bf16 %v3806_v35, %v3734_v42  ;;  %v3072_v46 = vpack.i.bf16 %v3789_v20, %v233_v36  ;;  %v42_v42 = vld [vmem:[%s5347_s0 + $0x78] sm:$0xff]  ;;  %v192_v15 = vrot.slane %v3806_v35, 1 }
  0x35   :  { %v74_v27 = vrot.slane %v42_v42, 7  ;;  %v196_v25 = vrot.slane %v122_v41, 1  ;;  %v3112_v28 = vpack.i.bf16 %v233_v36, %v3810_v38 }
  0x37   :  { %3033 = vrot.lane.b32.xlu0 %v3032_v49, %s3423_s23  ;;  %3048 = vrot.lane.b32.xlu1 %v3047_v51, %s3422_s22  ;;  %v189_v49 = vrot.slane %v3757_v53, 1  ;;  %v240_v51 = vrot.slane %v3810_v38, 2  ;;  %v107_v3 = vsel %vm91_vm0, 0.0, %v74_v27  ;;  %v123_v4 = vsel %vm91_vm0, %v74_v27, 0.0 }
  0x38   :  { %v272_v5 = vrot.slane %v107_v3, 2  ;;  %v273_v21 = vrot.slane %v123_v4, 2 }
  0x39   :  { %v3838_v62 = vsel %vm153_vm2, %v189_v49, %v190_v50  ;;  %v242_v63 = vsel %vm198_vm1, %v240_v51, %v241_v52 }
  0x3a   :  { %2887 = vmatmul.mubr.msk.bf16.gmra.mxu1 %vm566_vm3, %v680_v7  ;;  %v3092_v9 = vpack.i.bf16 %v3838_v62, %v3835_v61  ;;  %v3107_v0 = vpack.i.bf16 %v242_v63, %v3838_v62  ;;  %v250_v7 = vrot.slane %v107_v3, 1 }
  0x3b   :  { %3043 = vrot.lane.b32.xlu0 %v3042_v54, %s3422_s22  ;;  %3058 = vrot.lane.b32.xlu1 %v3057_v26, %s3421_s11  ;;  %v237_v54 = vrot.slane %v3806_v35, 2  ;;  %v238_v26 = vrot.slane %v121_v57, 2 }
  0x3d   :  { %v239_v2 = vsel %vm198_vm1, %v237_v54, %v238_v26 }
  0x3e   :  { %v3102_v10 = vpack.i.bf16 %v3835_v61, %v239_v2  ;;  %v683_v36 = vpack.c.bf16 %v242_v63, %v239_v2  ;;  %v3137_v51 = vpack.i.bf16 %v242_v63, %v239_v2 }
  0x3f   :  { %3053 = vrot.lane.b32.xlu0 %v3052_v16, %s3421_s11  ;;  %3068 = vrot.lane.b32.xlu1 %v3067_v19, %s3423_s23  ;;  %v3117_v16 = vpack.i.bf16 %v107_v3, %v236_v23  ;;  %v193_v19 = vrot.slane %v121_v57, 1  ;;  %v3127_v23 = vpack.i.bf16 %v3806_v35, %v3757_v53 }
  0x40   :  { %2890 = vmatprep.mubr.msk.bf16.mxu1 %vm566_vm3, %v683_v36 }
  0x43   :  { %3063 = vrot.lane.b32.xlu0 %v3062_v32, %s3423_s23  ;;  %3078 = vrot.lane.b32.xlu1 %v3077_v33, %s3422_s22  ;;  %v3860_v32 = vsel %vm153_vm2, %v192_v15, %v193_v19  ;;  %v274_v33 = vsel %vm198_vm1, %v272_v5, %v273_v21 }
  0x44   :  { %v686_v41 = vpack.c.bf16 %v3477_v8, %v274_v33  ;;  %v3132_v49 = vpack.i.bf16 %v3860_v32, %v274_v33 }
  0x46   :  { %2891 = vmatmul.mubr.msk.bf16.gmra.mxu1 %vm566_vm3, %v686_v41 }
  0x47   :  { %3073 = vrot.lane.b32.xlu0 %v3072_v46, %s3422_s22  ;;  %3088 = vrot.lane.b32.xlu1 %v3087_v45, %s3421_s11  ;;  %v3864_v45 = vsel %vm153_vm2, %v195_v24, %v196_v25  ;;  %v251_v46 = vrot.slane %v123_v4, 1 }
  0x48   :  { %v3122_v47 = vpack.i.bf16 %v3864_v45, %v3860_v32 }
  0x49   :  { %v3873_v48 = vsel %vm153_vm2, %v250_v7, %v251_v46 }
  0x4a   :  { %v3142_v50 = vpack.i.bf16 %v3810_v38, %v3873_v48 }
  0x4b   :  { %3083 = vrot.lane.b32.xlu0 %v3082_v58, %s3421_s11  ;;  %3098 = vrot.lane.b32.xlu1 %v3097_v60, %s3423_s23 }
  0x4f   :  { %3093 = vrot.lane.b32.xlu0 %v3092_v9, %s3423_s23  ;;  %3108 = vrot.lane.b32.xlu1 %v3107_v0, %s3422_s22 }
  0x53   :  { %3103 = vrot.lane.b32.xlu0 %v3102_v10, %s3422_s22  ;;  %3118 = vrot.lane.b32.xlu1 %v3117_v16, %s3421_s11 }
  0x57   :  { %3113 = vrot.lane.b32.xlu0 %v3112_v28, %s3421_s11  ;;  %3128 = vrot.lane.b32.xlu1 %v3127_v23, %s3423_s23 }
  0x5b   :  { %3123 = vrot.lane.b32.xlu0 %v3122_v47, %s3423_s23  ;;  %318 = vrot.lane.b32.xlu1 %v3864_v45, %s3422_s22 }
  0x5f   :  { %3133 = vrot.lane.b32.xlu0 %v3132_v49, %s3422_s22  ;;  %3143 = vrot.lane.b32.xlu1 %v3142_v50, %s3423_s23 }
  0x63   :  { %3138 = vrot.lane.b32.xlu0 %v3137_v51, %s3421_s11 }
  0x67   :  { %410 = vrot.lane.b32.xlu0 %v107_v3, %s3423_s23 }
  0x79   :  { %v2924_v52 = vpop.permute.xlu1 %2923 }
  0x7a   :  { %v2926_v10 = vunpack.i.h.bf16 %v2924_v52  ;;  %v2925_v16 = vunpack.i.l.bf16 %v2924_v52 }
  0x7d   :  { %v2934_v57 = vpop.permute.xlu0 %2933  ;;  %v2929_v42 = vpop.permute.xlu1 %2928 }
  0x7e   :  { %v2936_v58 = vunpack.i.h.bf16 %v2934_v57  ;;  %v2935_v60 = vunpack.i.l.bf16 %v2934_v57  ;;  %v2931_v63 = vunpack.i.h.bf16 %v2929_v42  ;;  %v2930_v2 = vunpack.i.l.bf16 %v2929_v42 }
  0x80   :  { %v615_v19 = vsel %vm566_vm3, %v3516_v34, %v2935_v60  ;;  %v616_v5 = vsel %vm566_vm3, %v3540_v43, %v2936_v58 }
  0x81   :  { %v2939_v54 = vpop.permute.xlu0 %2938  ;;  %v2944_v26 = vpop.permute.xlu1 %2943  ;;  %v631_v7 = vsel %vm582_vm4, %v615_v19, %v2925_v16 }
  0x82   :  { %v2941_v27 = vunpack.i.h.bf16 %v2939_v54  ;;  %v2940_v9 = vunpack.i.l.bf16 %v2939_v54  ;;  %v2946_v0 = vunpack.i.h.bf16 %v2944_v26  ;;  %v2945_v4 = vunpack.i.l.bf16 %v2944_v26 }
  0x84   :  { %v568_v3 = vsel %vm566_vm3, %v3489_v13, %v2941_v27  ;;  %v567_v15 = vsel %vm566_vm3, 0.0, %v2940_v9  ;;  %v632_v13 = vsel %vm582_vm4, %v616_v5, %v2926_v10 }
  0x85   :  { %v3894_v21 = vsel %vm582_vm4, %v567_v15, %v2945_v4  ;;  %v2949_v24 = vpop.permute.xlu0 %2948  ;;  %v2959_v25 = vpop.permute.xlu1 %2958  ;;  %v584_v28 = vsel %vm582_vm4, %v568_v3, %v2946_v0 }
  0x86   :  { %v2951_v23 = vunpack.i.h.bf16 %v2949_v24  ;;  %v2950_v33 = vunpack.i.l.bf16 %v2949_v24  ;;  %v599_v41 = vsel %vm598_vm5, %v3894_v21, %v2930_v2  ;;  %v600_v34 = vsel %vm598_vm5, %v584_v28, %v2931_v63 }
  0x87   :  { %v2961_v50 = vunpack.i.h.bf16 %v2959_v25  ;;  %v2960_v51 = vunpack.i.l.bf16 %v2959_v25  ;;  %v663_v52 = vpack.c.bf16 %v600_v34, %v599_v41 }
  0x88   :  { %v647_v43 = vsel %vm598_vm5, %v631_v7, %v2950_v33  ;;  %v648_v46 = vsel %vm598_vm5, %v632_v13, %v2951_v23 }
  0x89   :  { %v2954_v36 = vpop.permute.xlu0 %2953  ;;  %v2969_v47 = vpop.permute.xlu1 %2968  ;;  %v664_v49 = vpack.c.bf16 %v648_v46, %v647_v43  ;;  %v570_v54 = vsel %vm566_vm3, %v3486_v12, %v2961_v50  ;;  %v569_v26 = vsel %vm566_vm3, %v3483_v11, %v2960_v51 }
  0x8a   :  { %v2956_v57 = vunpack.i.h.bf16 %v2954_v36  ;;  %v2955_v42 = vunpack.i.l.bf16 %v2954_v36  ;;  %v2971_v27 = vunpack.i.h.bf16 %v2969_v47  ;;  %v2970_v9 = vunpack.i.l.bf16 %v2969_v47 }
  0x8b   :  { %887 = vmatprep.mubr.bf16.mxu0 %v664_v49 }
  0x8c   :  { %888 = vmatmul.mubr.bf16.vlgmr.msra.gmra.mxu0 %v663_v52  ;;  %v618_v63 = vsel %vm566_vm3, %v3600_v17, %v2956_v57  ;;  %v617_v2 = vsel %vm566_vm3, %v3543_v44, %v2955_v42  ;;  %v585_v19 = vsel %vm582_vm4, %v569_v26, %v2970_v9  ;;  %v586_v12 = vsel %vm582_vm4, %v570_v54, %v2971_v27 }
  0x8d   :  { %v2964_v58 = vpop.permute.xlu0 %2963  ;;  %v2979_v60 = vpop.permute.xlu1 %2978 }
  0x8e   :  { %v2966_v0 = vunpack.i.h.bf16 %v2964_v58  ;;  %v2965_v4 = vunpack.i.l.bf16 %v2964_v58  ;;  %v2981_v10 = vunpack.i.h.bf16 %v2979_v60  ;;  %v2980_v16 = vunpack.i.l.bf16 %v2979_v60 }
  0x90   :  { %v633_v24 = vsel %vm582_vm4, %v617_v2, %v2965_v4  ;;  %v634_v25 = vsel %vm582_vm4, %v618_v63, %v2966_v0  ;;  %v601_v28 = vsel %vm598_vm5, %v585_v19, %v2980_v16  ;;  %v602_v23 = vsel %vm598_vm5, %v586_v12, %v2981_v10 }
  0x91   :  { %v2974_v3 = vpop.permute.xlu0 %2973  ;;  %v2989_v15 = vpop.permute.xlu1 %2988  ;;  %v666_v43 = vpack.c.bf16 %v602_v23, %v601_v28 }
  0x92   :  { %v2976_v5 = vunpack.i.h.bf16 %v2974_v3  ;;  %v2975_v11 = vunpack.i.l.bf16 %v2974_v3  ;;  %v2991_v41 = vunpack.i.h.bf16 %v2989_v15  ;;  %v2990_v34 = vunpack.i.l.bf16 %v2989_v15 }
  0x94   :  { %v649_v17 = vsel %vm598_vm5, %v633_v24, %v2975_v11  ;;  %v650_v44 = vsel %vm598_vm5, %v634_v25, %v2976_v5  ;;  %v572_v50 = vsel %vm566_vm3, %v3561_v55, %v2991_v41  ;;  %v571_v51 = vsel %vm566_vm3, %v3523_v37, %v2990_v34 }
  0x95   :  { %v2984_v33 = vpop.permute.xlu0 %2983  ;;  %v2999_v7 = vpop.permute.xlu1 %2998  ;;  %v667_v13 = vpack.c.bf16 %v650_v44, %v649_v17 }
  0x96   :  { %v2986_v46 = vunpack.i.h.bf16 %v2984_v33  ;;  %v2985_v36 = vunpack.i.l.bf16 %v2984_v33  ;;  %v3001_v52 = vunpack.i.h.bf16 %v2999_v7  ;;  %v3000_v57 = vunpack.i.l.bf16 %v2999_v7 }
  0x97   :  { %895 = vmatprep.mubr.bf16.mxu0 %v667_v13 }
  0x98   :  { %896 = vmatmul.mubr.bf16.gmra.mxu0 %v666_v43  ;;  %v620_v26 = vsel %vm566_vm3, %v3671_v56, %v2986_v46  ;;  %v619_v27 = vsel %vm566_vm3, %v3603_v18, %v2985_v36  ;;  %v587_v4 = vsel %vm582_vm4, %v571_v51, %v3000_v57  ;;  %v588_v55 = vsel %vm582_vm4, %v572_v50, %v3001_v52 }
  0x99   :  { %v2994_v47 = vpop.permute.xlu0 %2993  ;;  %v3009_v49 = vpop.permute.xlu1 %3008 }
  0x9a   :  { %v2996_v42 = vunpack.i.h.bf16 %v2994_v47  ;;  %v2995_v58 = vunpack.i.l.bf16 %v2994_v47  ;;  %v3011_v60 = vunpack.i.h.bf16 %v3009_v49  ;;  %v3010_v54 = vunpack.i.l.bf16 %v3009_v49 }
  0x9c   :  { %v635_v16 = vsel %vm582_vm4, %v619_v27, %v2995_v58  ;;  %v636_v63 = vsel %vm582_vm4, %v620_v26, %v2996_v42  ;;  %v603_v2 = vsel %vm598_vm5, %v587_v4, %v3010_v54  ;;  %v604_v3 = vsel %vm598_vm5, %v588_v55, %v3011_v60 }
  0x9d   :  { %v3004_v9 = vpop.permute.xlu0 %3003  ;;  %v3019_v0 = vpop.permute.xlu1 %3018  ;;  %v669_v24 = vpack.c.bf16 %v604_v3, %v603_v2 }
  0x9e   :  { %v3006_v10 = vunpack.i.h.bf16 %v3004_v9  ;;  %v3005_v37 = vunpack.i.l.bf16 %v3004_v9  ;;  %v3021_v5 = vunpack.i.h.bf16 %v3019_v0  ;;  %v3020_v11 = vunpack.i.l.bf16 %v3019_v0 }
  0xa0   :  { %v651_v56 = vsel %vm598_vm5, %v635_v16, %v3005_v37  ;;  %v652_v18 = vsel %vm598_vm5, %v636_v63, %v3006_v10  ;;  %v574_v44 = vsel %vm566_vm3, %v3631_v29, %v3021_v5  ;;  %v573_v33 = vsel %vm566_vm3, %v3579_v1, %v3020_v11 }
  0xa1   :  { %v3014_v15 = vpop.permute.xlu0 %3013  ;;  %v3029_v19 = vpop.permute.xlu1 %3028  ;;  %v670_v12 = vpack.c.bf16 %v652_v18, %v651_v56 }
  0xa2   :  { %v3016_v25 = vunpack.i.h.bf16 %v3014_v15  ;;  %v3015_v28 = vunpack.i.l.bf16 %v3014_v15  ;;  %v3031_v7 = vunpack.i.h.bf16 %v3029_v19  ;;  %v3030_v13 = vunpack.i.l.bf16 %v3029_v19 }
  0xa3   :  { %903 = vmatprep.mubr.bf16.mxu0 %v670_v12 }
  0xa4   :  { %904 = vmatmul.mubr.bf16.gmra.mxu0 %v669_v24  ;;  %v622_v36 = vsel %vm566_vm3, %v3727_v39, %v3016_v25  ;;  %v621_v47 = vsel %vm566_vm3, %v3675_v59, %v3015_v28  ;;  %v589_v29 = vsel %vm582_vm4, %v573_v33, %v3030_v13  ;;  %v590_v1 = vsel %vm582_vm4, %v574_v44, %v3031_v7 }
  0xa5   :  { %v3024_v23 = vpop.permute.xlu0 %3023  ;;  %v3039_v17 = vpop.permute.xlu1 %3038 }
  0xa6   :  { %v3940_v41 = vunpack.i.h.bf16 %v3024_v23  ;;  %v3025_v34 = vunpack.i.l.bf16 %v3024_v23  ;;  %v3041_v43 = vunpack.i.h.bf16 %v3039_v17  ;;  %v3040_v46 = vunpack.i.l.bf16 %v3039_v17 }
  0xa8   :  { %v637_v57 = vsel %vm582_vm4, %v621_v47, %v3025_v34  ;;  %v638_v42 = vsel %vm582_vm4, %v622_v36, %v3940_v41  ;;  %v605_v39 = vsel %vm598_vm5, %v589_v29, %v3040_v46  ;;  %v606_v58 = vsel %vm598_vm5, %v590_v1, %v3041_v43 }
  0xa9   :  { %v3034_v49 = vpop.permute.xlu0 %3033  ;;  %v3946_v50 = vpop.permute.xlu1 %3048  ;;  %v672_v0 = vpack.c.bf16 %v606_v58, %v605_v39 }
  0xaa   :  { %v3950_v51 = vunpack.i.h.bf16 %v3034_v49  ;;  %v3035_v52 = vunpack.i.l.bf16 %v3034_v49  ;;  %v3050_v9 = vunpack.i.l.bf16 %v3946_v50  ;;  %v3051_v46 = vunpack.i.h.bf16 %v3946_v50 }
  0xac   :  { %v653_v59 = vsel %vm598_vm5, %v637_v57, %v3035_v52  ;;  %v654_v60 = vsel %vm598_vm5, %v638_v42, %v3950_v51  ;;  %v575_v37 = vsel %vm566_vm3, %v3693_v6, %v3050_v9 }
  0xad   :  { %v3044_v54 = vpop.permute.xlu0 %3043  ;;  %v3059_v26 = vpop.permute.xlu1 %3058  ;;  %v673_v27 = vpack.c.bf16 %v654_v60, %v653_v59  ;;  %v625_v60 = vsel %vm566_vm3, %v3793_v22, %v3051_v46 }
  0xae   :  { %v3046_v4 = vunpack.i.h.bf16 %v3044_v54  ;;  %v3045_v16 = vunpack.i.l.bf16 %v3044_v54  ;;  %v3060_v63 = vunpack.i.l.bf16 %v3059_v26  ;;  %v3061_v36 = vunpack.i.h.bf16 %v3059_v26 }
  0xaf   :  { %911 = vmatprep.mubr.bf16.mxu0 %v673_v27 }
  0xb0   :  { %912 = vmatmul.mubr.bf16.gmra.mxu0 %v672_v0  ;;  %v624_v15 = vsel %vm566_vm3, %v3789_v20, %v3046_v4  ;;  %v623_v5 = vsel %vm566_vm3, %v3730_v40, %v3045_v16  ;;  %v591_v11 = vsel %vm582_vm4, %v575_v37, %v3060_v63  ;;  %v641_v4 = vsel %vm582_vm4, %v625_v60, %v3061_v36 }
  0xb1   :  { %v3054_v55 = vpop.permute.xlu0 %3053  ;;  %v3069_v10 = vpop.permute.xlu1 %3068 }
  0xb2   :  { %v3056_v2 = vunpack.i.h.bf16 %v3054_v55  ;;  %v3055_v3 = vunpack.i.l.bf16 %v3054_v55  ;;  %v3071_v56 = vunpack.i.h.bf16 %v3069_v10  ;;  %v3070_v18 = vunpack.i.l.bf16 %v3069_v10 }
  0xb4   :  { %v639_v6 = vsel %vm582_vm4, %v623_v5, %v3055_v3  ;;  %v640_v28 = vsel %vm582_vm4, %v624_v15, %v3056_v2  ;;  %v607_v23 = vsel %vm598_vm5, %v3894_v21, %v3070_v18  ;;  %v608_v17 = vsel %vm598_vm5, %v591_v11, %v3071_v56 }
  0xb5   :  { %v3064_v19 = vpop.permute.xlu0 %3063  ;;  %v3079_v12 = vpop.permute.xlu1 %3078  ;;  %v675_v34 = vpack.c.bf16 %v608_v17, %v607_v23 }
  0xb6   :  { %v3066_v24 = vunpack.i.h.bf16 %v3064_v19  ;;  %v3065_v25 = vunpack.i.l.bf16 %v3064_v19  ;;  %v3080_v13 = vunpack.i.l.bf16 %v3079_v12  ;;  %v3081_v16 = vunpack.i.h.bf16 %v3079_v12 }
  0xb8   :  { %v655_v20 = vsel %vm598_vm5, %v639_v6, %v3065_v25  ;;  %v656_v44 = vsel %vm598_vm5, %v640_v28, %v3066_v24  ;;  %v577_v29 = vsel %vm566_vm3, %v3697_v14, %v3080_v13  ;;  %v627_v15 = vsel %vm566_vm3, %v3838_v62, %v3081_v16 }
  0xb9   :  { %v3074_v33 = vpop.permute.xlu0 %3073  ;;  %v3089_v7 = vpop.permute.xlu1 %3088  ;;  %v676_v40 = vpack.c.bf16 %v656_v44, %v655_v20 }
  0xba   :  { %v3076_v43 = vunpack.i.h.bf16 %v3074_v33  ;;  %v3075_v1 = vunpack.i.l.bf16 %v3074_v33  ;;  %v3090_v52 = vunpack.i.l.bf16 %v3089_v7  ;;  %v3091_v19 = vunpack.i.h.bf16 %v3089_v7 }
  0xbb   :  { %919 = vmatprep.mubr.bf16.mxu0 %v676_v40 }
  0xbc   :  { %920 = vmatmul.mubr.bf16.gmra.mxu0 %v675_v34  ;;  %v576_v42 = vsel %vm566_vm3, %v3711_v31, %v3076_v43  ;;  %v626_v27 = vsel %vm566_vm3, %v3835_v61, %v3075_v1  ;;  %v593_v14 = vsel %vm582_vm4, %v577_v29, %v3090_v52  ;;  %v643_v62 = vsel %vm582_vm4, %v627_v15, %v3091_v19 }
  0xbd   :  { %v3084_v47 = vpop.permute.xlu0 %3083  ;;  %v3099_v49 = vpop.permute.xlu1 %3098 }
  0xbe   :  { %v3086_v57 = vunpack.i.h.bf16 %v3084_v47  ;;  %v3085_v39 = vunpack.i.l.bf16 %v3084_v47  ;;  %v3101_v58 = vunpack.i.h.bf16 %v3099_v49  ;;  %v3100_v59 = vunpack.i.l.bf16 %v3099_v49 }
  0xc0   :  { %v592_v50 = vsel %vm582_vm4, %v576_v42, %v3086_v57  ;;  %v642_v31 = vsel %vm582_vm4, %v626_v27, %v3085_v39  ;;  %v610_v10 = vsel %vm598_vm5, %v593_v14, %v3101_v58 }
  0xc1   :  { %v3094_v54 = vpop.permute.xlu0 %3093  ;;  %v3109_v26 = vpop.permute.xlu1 %3108  ;;  %v609_v55 = vsel %vm598_vm5, %v592_v50, %v3100_v59 }
  0xc2   :  { %v3096_v9 = vunpack.i.h.bf16 %v3094_v54  ;;  %v3095_v0 = vunpack.i.l.bf16 %v3094_v54  ;;  %v3110_v3 = vunpack.i.l.bf16 %v3109_v26  ;;  %v678_v56 = vpack.c.bf16 %v610_v10, %v609_v55 }
  0xc3   :  { %v3111_v44 = vunpack.i.h.bf16 %v3109_v26 }
  0xc4   :  { %v657_v22 = vsel %vm598_vm5, %v641_v4, %v3095_v0  ;;  %v658_v37 = vsel %vm598_vm5, %v642_v31, %v3096_v9  ;;  %v579_v24 = vsel %vm566_vm3, %v3757_v53, %v3110_v3 }
  0xc5   :  { %v3104_v63 = vpop.permute.xlu0 %3103  ;;  %v3119_v2 = vpop.permute.xlu1 %3118  ;;  %v679_v61 = vpack.c.bf16 %v658_v37, %v657_v22  ;;  %v629_v49 = vsel %vm566_vm3, %v3864_v45, %v3111_v44 }
  0xc6   :  { %v3106_v18 = vunpack.i.h.bf16 %v3104_v63  ;;  %v3105_v25 = vunpack.i.l.bf16 %v3104_v63  ;;  %v3120_v6 = vunpack.i.l.bf16 %v3119_v2  ;;  %v3121_v46 = vunpack.i.h.bf16 %v3119_v2 }
  0xc7   :  { %927 = vmatprep.mubr.bf16.mxu0 %v679_v61 }
  0xc8   :  { %928 = vmatmul.mubr.bf16.gmra.mxu0 %v678_v56  ;;  %v578_v28 = vsel %vm566_vm3, %v3753_v30, %v3106_v18  ;;  %v628_v13 = vsel %vm566_vm3, %v3860_v32, %v3105_v25  ;;  %v595_v53 = vsel %vm582_vm4, %v579_v24, %v3120_v6  ;;  %v645_v59 = vsel %vm582_vm4, %v629_v49, %v3121_v46  ;;  %v3381_v18 = vld [vmem:[%s5349_s4 + $0x80] sm:$0xff]  }
  0xc9   :  { %v3114_v5 = vpop.permute.xlu0 %3113  ;;  %v3129_v11 = vpop.permute.xlu1 %3128 }
  0xca   :  { %v3116_v12 = vunpack.i.h.bf16 %v3114_v5  ;;  %v3115_v23 = vunpack.i.l.bf16 %v3114_v5  ;;  %v3131_v17 = vunpack.i.h.bf16 %v3129_v11  ;;  %v3130_v20 = vunpack.i.l.bf16 %v3129_v11 }
  0xcc   :  { %v594_v33 = vsel %vm582_vm4, %v578_v28, %v3116_v12  ;;  %v644_v30 = vsel %vm582_vm4, %v628_v13, %v3115_v23  ;;  %v612_v47 = vsel %vm598_vm5, %v595_v53, %v3131_v17 }
  0xcd   :  { %v3124_v7 = vpop.permute.xlu0 %3123  ;;  %v319_v40 = vpop.permute.xlu1 %318  ;;  %v611_v36 = vsel %vm598_vm5, %v594_v33, %v3130_v20 }
  0xce   :  { %v3126_v34 = vunpack.i.h.bf16 %v3124_v7  ;;  %v3125_v43 = vunpack.i.l.bf16 %v3124_v7  ;;  %v681_v58 = vpack.c.bf16 %v612_v47, %v611_v36  ;;  %v581_v4 = vsel %vm566_vm3, %v3810_v38, %v319_v40 }
  0xd0   :  { %v659_v29 = vsel %vm598_vm5, %v643_v62, %v3125_v43  ;;  %v660_v1 = vsel %vm598_vm5, %v644_v30, %v3126_v34 }
  0xd1   :  { %v3134_v52 = vpop.permute.xlu0 %3133  ;;  %v3144_v32 = vpop.permute.xlu1 %3143  ;;  %v682_v57 = vpack.c.bf16 %v660_v1, %v659_v29 }
  0xd2   :  { %v3135_v42 = vunpack.i.l.bf16 %v3134_v52  ;;  %v3145_v39 = vunpack.i.l.bf16 %v3144_v32  ;;  %v3136_v60 = vunpack.i.h.bf16 %v3134_v52  ;;  %v3146_v54 = vunpack.i.h.bf16 %v3144_v32 }
  0xd3   :  { %935 = vmatprep.mubr.bf16.mxu0 %v682_v57 }
  0xd4   :  { %v630_v50 = vsel %vm566_vm3, %v3873_v48, %v3135_v42  ;;  %936 = vmatmul.mubr.bf16.gmra.mxu0 %v681_v58  ;;  %v661_v45 = vsel %vm598_vm5, %v645_v59, %v3145_v39  ;;  %v580_v31 = vsel %vm566_vm3, %v3806_v35, %v3136_v60  ;;  %v4029_v35 = vld [vmem:[%s5349_s4 + $0x88] sm:$0xff]  }
  0xd5   :  { %v3139_v26 = vpop.permute.xlu0 %3138  ;;  %v646_v27 = vsel %vm582_vm4, %v630_v50, %v3940_v41  ;;  %2894 = vmatprep.subr.bf16.mxu0 %v4029_v35 }
  0xd6   :  { %v3141_v14 = vunpack.i.h.bf16 %v3139_v26  ;;  %v3140_v9 = vunpack.i.l.bf16 %v3139_v26  ;;  %v662_v0 = vsel %vm598_vm5, %v646_v27, %v3950_v51  ;;  %2895 = vmatpush3.bf16.msra.mxu0 %v4029_v35 }
  0xd7   :  { %v685_v48 = vpack.c.bf16 %v662_v0, %v661_v45  ;;  %2896 = vmatprep.subr.bf16.mxu0 %v3381_v18 }
  0xd8   :  { %v596_v55 = vsel %vm582_vm4, %v580_v31, %v3140_v9  ;;  %v597_v10 = vsel %vm582_vm4, %v581_v4, %v3141_v14 }
  0xd9   :  { %v411_v22 = vpop.permute.xlu0 %410  ;;  %v613_v37 = vsel %vm598_vm5, %v596_v55, %v3146_v54  ;;  %943 = vmatprep.mubr.bf16.mxu0 %v685_v48 }
  0xda   :  { %v614_v16 = vsel %vm598_vm5, %v597_v10, %v411_v22  ;;  %2897 = vmatpush3.bf16.msra.mxu0 %v3381_v18 }
  0xdb   :  { %v684_v63 = vpack.c.bf16 %v614_v16, %v613_v37 }
  0xdd   :  { %944 = vmatmul.mubr.bf16.gmra.mxu0 %v684_v63 }
  0xea   :  { %v2880_v11 = vpop.f32.mrf.mxu1 }
  0xec   :  { %v986_v6 = vpop.f32.mrf.mxu1 }
  0xee   :  { %v2881_v28 = vpop.f32.mrf.mxu1 }
  0xf0   :  { %v989_v17 = vpop.f32.mrf.mxu1 }
  0xf2   :  { %v2884_v44 = vpop.f32.mrf.mxu1 }
  0xf4   :  { %v1002_v62 = vpop.f32.mrf.mxu1 }
  0xf6   :  { %v2885_v40 = vpop.f32.mrf.mxu1 }
  0xf8   :  { %v1005_v34 = vpop.f32.mrf.mxu1 }
  0xfa   :  { %v4036_v30 = vpop.f32.mrf.mxu1 }
  0xfc   :  { %v1018_v52 = vpop.f32.mrf.mxu1 }
  0xfe   :  { %v2889_v50 = vpop.f32.mrf.mxu1 }
 0x100   :  { %v1021_v37 = vpop.f32.mrf.mxu1 }
 0x14c   :  { %v2742_v2 = vpop.f32.mrf.mxu0 }
 0x14e   :  { %v2743_v61 = vpop.f32.mrf.mxu0 }
 0x14f   :  { %v2744_v36 = vadd.f32 %v2743_v61, %v2742_v2 }
 0x150   :  { %v2745_v3 = vpop.f32.mrf.mxu0 }
 0x151   :  { %v4040_v32 = vadd.f32 %v2744_v36, %v986_v6 }
 0x152   :  { %v2746_v38 = vpop.f32.mrf.mxu0 }
 0x153   :  { %v2747_v46 = vadd.f32 %v2746_v38, %v2745_v3  ;;  %v1088_v54 = vmul.f32 %v4040_v32, %v4040_v32  ;;  %v1051_v4 = vsel %vm566_vm3, %v4040_v32, 0.0 }
 0x155   :  { %v4038_v29 = vadd.f32 %v2747_v46, %v989_v17  ;;  %v1104_v16 = vsel %vm566_vm3, %v1088_v54, 0.0 }
 0x157   :  { %v1089_v59 = vmul.f32 %v4038_v29, %v4038_v29  ;;  %v1052_v27 = vsel %vm566_vm3, %v4038_v29, 0.0 }
 0x158   :  { %v2748_v56 = vpop.f32.mrf.mxu0  ;;  %v1053_v63 = vadd.f32 %v1052_v27, %v1051_v4 }
 0x159   :  { %v1105_v48 = vsel %vm566_vm3, %v1089_v59, 0.0 }
 0x15a   :  { %v2749_v15 = vpop.f32.mrf.mxu0 }
 0x15b   :  { %v2750_v47 = vadd.f32 %v2749_v15, %v2748_v56  ;;  %v4073_v15 = vpop.f32.mrf.mxu1 }
 0x15c   :  { %v2751_v19 = vpop.f32.mrf.mxu0 }
 0x15d   :  { %v4042_v42 = vadd.f32 %v2880_v11, %v2750_v47 }
 0x15e   :  { %v2752_v5 = vpop.f32.mrf.mxu0 }
 0x15f   :  { %v2753_v1 = vadd.f32 %v2752_v5, %v2751_v19  ;;  %v1090_v14 = vmul.f32 %v4042_v42, %v4042_v42  ;;  %v1054_v55 = vsel %vm566_vm3, %v4042_v42, 0.0  ;;  %v1106_v19 = vadd.f32 %v1105_v48, %v1104_v16 }
 0x160   :  { %v1055_v5 = vadd.f32 %v1054_v55, %v1053_v63 }
 0x161   :  { %v4046_v60 = vadd.f32 %v2881_v28, %v2753_v1  ;;  %v1107_v3 = vsel %vm566_vm3, %v1090_v14, 0.0 }
 0x162   :  { %v1108_v28 = vadd.f32 %v1107_v3, %v1106_v19 }
 0x163   :  { %v1091_v10 = vmul.f32 %v4046_v60, %v4046_v60  ;;  %v1056_v38 = vsel %vm566_vm3, %v4046_v60, 0.0 }
 0x164   :  { %v2754_v24 = vpop.f32.mrf.mxu0 }
 0x166   :  { %v2755_v25 = vpop.f32.mrf.mxu0 }
 0x167   :  { %v2756_v57 = vadd.f32 %v2755_v25, %v2754_v24  ;;  %v1109_v24 = vsel %vm566_vm3, %v1091_v10, 0.0 }
 0x168   :  { %v2757_v12 = vpop.f32.mrf.mxu0 }
 0x169   :  { %v4050_v26 = vadd.f32 %v2756_v57, %v1002_v62 }
 0x16a   :  { %v2758_v23 = vpop.f32.mrf.mxu0 }
 0x16b   :  { %v2759_v58 = vadd.f32 %v2758_v23, %v2757_v12  ;;  %v1092_v2 = vmul.f32 %v4050_v26, %v4050_v26  ;;  %v1058_v25 = vsel %vm566_vm3, %v4050_v26, 0.0  ;;  %v1057_v23 = vadd.f32 %v1056_v38, %v1055_v5 }
 0x16d   :  { %v4058_v31 = vadd.f32 %v2759_v58, %v1005_v34  ;;  %v1111_v17 = vsel %vm566_vm3, %v1092_v2, 0.0  ;;  %v1110_v34 = vadd.f32 %v1109_v24, %v1108_v28 }
 0x16f   :  { %v1093_v11 = vmul.f32 %v4058_v31, %v4058_v31  ;;  %v1112_v1 = vadd.f32 %v1111_v17, %v1110_v34 }
 0x170   :  { %v2760_v20 = vpop.f32.mrf.mxu0 }
 0x172   :  { %v2761_v33 = vpop.f32.mrf.mxu0 }
 0x173   :  { %v2762_v9 = vadd.f32 %v2761_v33, %v2760_v20 }
 0x174   :  { %v2763_v7 = vpop.f32.mrf.mxu0 }
 0x175   :  { %v4071_v56 = vadd.f32 %v2884_v44, %v2762_v9  ;;  %v1060_v44 = vsel %vm566_vm3, %v4058_v31, 0.0 }
 0x176   :  { %v2764_v13 = vpop.f32.mrf.mxu0 }
 0x177   :  { %v2765_v22 = vadd.f32 %v2764_v13, %v2763_v7  ;;  %v1094_v33 = vmul.f32 %v4071_v56, %v4071_v56  ;;  %v1034_v13 = vpop.f32.mrf.mxu1 }
 0x179   :  { %v4080_v6 = vadd.f32 %v2885_v40, %v2765_v22  ;;  %v1113_v40 = vsel %vm566_vm3, %v1093_v11, 0.0  ;;  %v2893_v54 = vpop.f32.mrf.mxu1 }
 0x17a   :  { %v1114_v27 = vadd.f32 %v1113_v40, %v1112_v1 }
 0x17b   :  { %v1095_v46 = vmul.f32 %v4080_v6, %v4080_v6  ;;  %v1037_v3 = vpop.f32.mrf.mxu1 }
 0x17c   :  { %v2766_v53 = vpop.f32.mrf.mxu0 }
 0x17e   :  { %v2767_v43 = vpop.f32.mrf.mxu0 }
 0x17f   :  { %v2768_v18 = vadd.f32 %v2767_v43, %v2766_v53  ;;  %v1059_v53 = vadd.f32 %v1058_v25, %v1057_v23  ;;  %v1062_v43 = vsel %vm566_vm3, %v4071_v56, 0.0 }
 0x180   :  { %v2769_v49 = vpop.f32.mrf.mxu0 }
 0x181   :  { %v4087_v62 = vadd.f32 %v2768_v18, %v1018_v52  ;;  %v1061_v57 = vadd.f32 %v1060_v44, %v1059_v53  ;;  %v1115_v52 = vsel %vm566_vm3, %v1094_v33, 0.0 }
 0x182   :  { %v2770_v39 = vpop.f32.mrf.mxu0  ;;  %v1116_v22 = vadd.f32 %v1115_v52, %v1114_v27 }
 0x183   :  { %v2771_v12 = vadd.f32 %v2770_v39, %v2769_v49  ;;  %v1064_v39 = vsel %vm566_vm3, %v4080_v6, 0.0  ;;  %v1096_v58 = vmul.f32 %v4087_v62, %v4087_v62  ;;  %v1063_v14 = vadd.f32 %v1062_v43, %v1061_v57 }
 0x184   :  { %v1066_v4 = vsel %vm566_vm3, %v4087_v62, 0.0 }
 0x185   :  { %v4094_v36 = vadd.f32 %v2771_v12, %v1021_v37  ;;  %v1065_v37 = vadd.f32 %v1064_v39, %v1063_v14 }
 0x187   :  { %v1097_v48 = vmul.f32 %v4094_v36, %v4094_v36  ;;  %v1068_v16 = vsel %vm566_vm3, %v4094_v36, 0.0  ;;  %v1067_v38 = vadd.f32 %v1066_v4, %v1065_v37 }
 0x188   :  { %v2772_v45 = vpop.f32.mrf.mxu0 }
 0x189   :  { %v1069_v25 = vadd.f32 %v1068_v16, %v1067_v38 }
 0x18a   :  { %v2773_v0 = vpop.f32.mrf.mxu0 }
 0x18b   :  { %v2774_v7 = vadd.f32 %v2773_v0, %v2772_v45  ;;  %v1117_v0 = vsel %vm566_vm3, %v1095_v46, 0.0 }
 0x18c   :  { %v2775_v61 = vpop.f32.mrf.mxu0  ;;  %v1118_v18 = vadd.f32 %v1117_v0, %v1116_v22 }
 0x18d   :  { %v4102_v59 = vadd.f32 %v4036_v30, %v2774_v7  ;;  %v1119_v30 = vsel %vm566_vm3, %v1096_v58, 0.0 }
 0x18e   :  { %v2776_v20 = vpop.f32.mrf.mxu0  ;;  %v1120_v24 = vadd.f32 %v1119_v30, %v1118_v18 }
 0x18f   :  { %v2777_v47 = vadd.f32 %v2776_v20, %v2775_v61  ;;  %v1098_v63 = vmul.f32 %v4102_v59, %v4102_v59  ;;  %v1070_v5 = vsel %vm566_vm3, %v4102_v59, 0.0 }
 0x190   :  { %v1071_v33 = vadd.f32 %v1070_v5, %v1069_v25 }
 0x191   :  { %v4109_v55 = vadd.f32 %v2889_v50, %v2777_v47  ;;  %v1121_v50 = vsel %vm566_vm3, %v1097_v48, 0.0  ;;  %v1123_v23 = vsel %vm566_vm3, %v1098_v63, 0.0 }
 0x192   :  { %v1122_v44 = vadd.f32 %v1121_v50, %v1120_v24 }
 0x193   :  { %v1099_v11 = vmul.f32 %v4109_v55, %v4109_v55  ;;  %v1072_v17 = vsel %vm566_vm3, %v4109_v55, 0.0 }
 0x194   :  { %v2778_v49 = vpop.f32.mrf.mxu0  ;;  %v1124_v43 = vadd.f32 %v1123_v23, %v1122_v44  ;;  %v1073_v46 = vadd.f32 %v1072_v17, %v1071_v33 }
 0x196   :  { %v2779_v45 = vpop.f32.mrf.mxu0 }
 0x197   :  { %v2780_v9 = vadd.f32 %v2779_v45, %v2778_v49 }
 0x198   :  { %v2781_v10 = vpop.f32.mrf.mxu0 }
 0x199   :  { %v4116_v2 = vadd.f32 %v2780_v9, %v1034_v13  ;;  %v1125_v13 = vsel %vm566_vm3, %v1099_v11, 0.0 }
 0x19a   :  { %v2782_v61 = vpop.f32.mrf.mxu0  ;;  %v1126_v39 = vadd.f32 %v1125_v13, %v1124_v43  ;;  %v3382_v13 = vld [vmem:[%s5349_s4 + $0x78] sm:$0xff]   ;;  %v3385_v43 = vld [vmem:[%s5349_s4 + $0x30] sm:$0xff]  }
 0x19b   :  { %v2783_v19 = vadd.f32 %v2782_v61, %v2781_v10  ;;  %v1100_v20 = vmul.f32 %v4116_v2, %v4116_v2  ;;  %v1074_v53 = vsel %vm566_vm3, %v4116_v2, 0.0  ;;  %2800 = vmatprep.subr.bf16.mxu1 %v3382_v13 }
 0x19c   :  { %v1075_v52 = vadd.f32 %v1074_v53, %v1073_v46  ;;  %v3383_v53 = vld [vmem:[%s5349_s4 + $0x38] sm:$0xff]   ;;  %v1151_v46 = vlaneseq }
 0x19d   :  { %v4123_v12 = vadd.f32 %v2783_v19, %v1037_v3  ;;  %v2784_v28 = vpop.f32.mrf.mxu0  ;;  %v1127_v49 = vsel %vm566_vm3, %v1100_v20, 0.0  ;;  %2801 = vmatpush3.bf16.msra.mxu1 %v3383_v53 }
 0x19e   :  { %v1128_v0 = vadd.f32 %v1127_v49, %v1126_v39  ;;  %v1049_v49 = vld [vmem:[%s5350_s2] sm:$0x1] }
 0x19f   :  { %v2785_v7 = vpop.f32.mrf.mxu0  ;;  %v1101_v34 = vmul.f32 %v4123_v12, %v4123_v12  ;;  %v1076_v1 = vsel %vm566_vm3, %v4123_v12, 0.0 }
 0x1a0   :  { %v2786_v40 = vadd.f32 %v2785_v7, %v2784_v28  ;;  %v1077_v4 = vadd.f32 %v1076_v1, %v1075_v52 }
 0x1a1   :  { %v2787_v47 = vpop.f32.mrf.mxu0  ;;  %v1129_v45 = vsel %vm566_vm3, %v1101_v34, 0.0  ;;  %v3384_v34 = vld [vmem:[%s5349_s4 + $0x70] sm:$0xff]  }
 0x1a2   :  { %v4139_v57 = vadd.f32 %v4073_v15, %v2786_v40  ;;  %v1130_v22 = vadd.f32 %v1129_v45, %v1128_v0  ;;  %2802 = vmatprep.subr.bf16.mxu1 %v3384_v34 }
 0x1a3   :  { %v2788_v58 = vpop.f32.mrf.mxu0  ;;  %2803 = vmatpush3.bf16.msra.mxu1 %v3385_v43 }
 0x1a4   :  { %v1078_v27 = vsel %vm566_vm3, %v4139_v57, 0.0  ;;  %v1102_v14 = vmul.f32 %v4139_v57, %v4139_v57  ;;  %v2789_v9 = vadd.f32 %v2788_v58, %v2787_v47  ;;  %v1152_v47 = vshrl.u32 %v1151_v46, 7  ;;  %v1050_v58 = vld [vmem:[%s5351_s3] sm:$0x1] }
 0x1a5   :  { %v1079_v15 = vadd.f32 %v1078_v27, %v1077_v4 }
 0x1a6   :  { %v1131_v48 = vsel %vm566_vm3, %v1102_v14, 0.0  ;;  %v1046_v10 = vadd.f32 %v2893_v54, %v2789_v9  ;;  %v4164_v1 = vsub.s32 0, %v1152_v47 }
 0x1a7   :  { %v1132_v16 = vadd.f32 %v1131_v48, %v1130_v22 }
 0x1a8   :  { %v1080_v37 = vsel %vm566_vm3, %v1046_v10, 0.0  ;;  %v1103_v30 = vmul.f32 %v1046_v10, %v1046_v10 }
 0x1a9   :  { %v1081_v63 = vadd.f32 %v1080_v37, %v1079_v15 }
 0x1aa   :  { %v1133_v61 = vsel %vm566_vm3, %v1103_v30, 0.0 }
 0x1ab   :  { %v1082_v3 = vrot.slane %v1081_v63, 4  ;;  %v1134_v38 = vadd.f32 %v1133_v61, %v1132_v16 }
 0x1ad   :  { %v1083_v18 = vadd.f32 %v1082_v3, %v1081_v63  ;;  %v1135_v19 = vrot.slane %v1134_v38, 4  ;;  %v3388_v3 = vld [vmem:[%s5349_s4 + $0x60] sm:$0xff]  }
 0x1af   :  { %v1084_v50 = vrot.slane %v1083_v18, 2  ;;  %v1136_v5 = vadd.f32 %v1135_v19, %v1134_v38 }
 0x1b1   :  { %v1085_v11 = vadd.f32 %v1084_v50, %v1083_v18  ;;  %v1137_v24 = vrot.slane %v1136_v5, 2 }
 0x1b3   :  { %v1086_v25 = vrot.slane %v1085_v11, 1  ;;  %v1138_v28 = vadd.f32 %v1137_v24, %v1136_v5  ;;  %v3389_v5 = vld [vmem:[%s5349_s4 + $0x20] sm:$0xff]  }
 0x1b5   :  { %v1087_v54 = vadd.f32 %v1086_v25, %v1085_v11  ;;  %v1139_v23 = vrot.slane %v1138_v28, 1 }
 0x1b7   :  { %v1140_v17 = vadd.f32 %v1139_v23, %v1138_v28  ;;  %v1141_v20 = vmul.f32 0.0078125, %v1087_v54 }
 0x1b9   :  { %v1142_v44 = vmul.f32 0.0078125, %v1140_v17  ;;  %v1143_v33 = vmul.f32 %v1141_v20, %v1141_v20 }
 0x1bb   :  { %v1144_v7 = vsub.f32 %v1142_v44, %v1143_v33 }
 0x1bd   :  { %v1145_v40 = vadd.f32 1e-05, %v1144_v7 }
 0x1bf   :  { %3398 = vrsqrt.f32 %v1145_v40 }
 0x1cc   :  { %v3399_v52 = vpop.eup %3398 }
 0x1cd   :  { %v1147_v39 = vmul.f32 %v3399_v52, %v1049_v49 }
 0x1cf   :  { %v1148_v45 = vmul.f32 %v1147_v39, %v1141_v20  ;;  %v4170_v27 = vrot.slane %v1147_v39, %v4164_v1 }
 0x1d1   :  { %v1149_v14 = vsub.f32 %v1050_v58, %v1148_v45  ;;  %v1171_v9 = vmul.f32 %v4170_v27, %v1046_v10  ;;  %v1157_v0 = vmul.f32 %v4170_v27, %v4038_v29  ;;  %v1158_v4 = vmul.f32 %v4170_v27, %v4042_v42 }
 0x1d2   :  { %v1156_v48 = vmul.f32 %v4170_v27, %v4040_v32  ;;  %v1165_v15 = vmul.f32 %v4170_v27, %v4094_v36  ;;  %v1166_v37 = vmul.f32 %v4170_v27, %v4102_v59  ;;  %v1159_v10 = vmul.f32 %v4170_v27, %v4046_v60  ;;  %v3386_v36 = vld [vmem:[%s5349_s4 + $0x68] sm:$0xff]  }
 0x1d3   :  { %v4180_v22 = vrot.slane %v1149_v14, %v4164_v1  ;;  %v1160_v29 = vmul.f32 %v4170_v27, %v4050_v26  ;;  %v1161_v42 = vmul.f32 %v4170_v27, %v4058_v31  ;;  %v4194_v32 = vmul.f32 %v4170_v27, %v4071_v56  ;;  %v3387_v60 = vld [vmem:[%s5349_s4 + $0x28] sm:$0xff]   ;;  %2804 = vmatprep.subr.bf16.mxu1 %v3386_v36  ;;  %v3390_v14 = vld [vmem:[%s5349_s4 + $0x58] sm:$0xff]  }
 0x1d4   :  { %v4198_v30 = vmul.f32 %v4170_v27, %v4080_v6  ;;  %v4221_v50 = vmul.f32 %v4170_v27, %v4123_v12  ;;  %2805 = vmatpush3.bf16.msra.mxu1 %v3387_v60 }
 0x1d5   :  { %v4207_v26 = vadd.f32 %v4180_v22, %v1171_v9  ;;  %v1179_v31 = vadd.f32 %v4180_v22, %v1157_v0  ;;  %v1180_v56 = vadd.f32 %v4180_v22, %v1158_v4  ;;  %v1178_v59 = vadd.f32 %v4180_v22, %v1156_v48  ;;  %2806 = vmatprep.subr.bf16.mxu1 %v3388_v3  ;;  %v3391_v9 = vld [vmem:[%s5349_s4 + $0x18] sm:$0xff]  }
 0x1d6   :  { %v1187_v6 = vadd.f32 %v4180_v22, %v1165_v15  ;;  %v1188_v16 = vadd.f32 %v4180_v22, %v1166_v37  ;;  %v1181_v63 = vadd.f32 %v4180_v22, %v1159_v10  ;;  %v1182_v61 = vadd.f32 %v4180_v22, %v1160_v29 }
 0x1d7   :  { %v1195_v38 = vmax.f32 %v1179_v31, 0.0  ;;  %v1196_v18 = vmax.f32 %v1180_v56, 0.0  ;;  %v1194_v19 = vmax.f32 %v1178_v59, 0.0  ;;  %v1183_v20 = vadd.f32 %v4180_v22, %v1161_v42 }
 0x1d8   :  { %v1203_v11 = vmax.f32 %v1187_v6, 0.0  ;;  %v1204_v24 = vmax.f32 %v1188_v16, 0.0  ;;  %v1197_v25 = vmax.f32 %v1181_v63, 0.0  ;;  %v1198_v28 = vmax.f32 %v1182_v61, 0.0  ;;  %2807 = vmatpush3.bf16.msra.mxu1 %v3389_v5 }
 0x1d9   :  { %v1227_v54 = vrot.slane %v1195_v38, 7  ;;  %v1228_v23 = vrot.slane %v1196_v18, 7  ;;  %v1226_v17 = vrot.slane %v1194_v19, 7  ;;  %2808 = vmatprep.subr.bf16.mxu1 %v3390_v14  ;;  %v1184_v61 = vadd.f32 %v4180_v22, %v4194_v32  ;;  %v3392_v32 = vld [vmem:[%s5349_s4 + $0x50] sm:$0xff]  }
 0x1da   :  { %v1235_v44 = vrot.slane %v1203_v11, 7  ;;  %v1236_v33 = vrot.slane %v1204_v24, 7  ;;  %v1229_v7 = vrot.slane %v1197_v25, 7  ;;  %v1230_v12 = vrot.slane %v1198_v28, 7  ;;  %v3393_v25 = vld [vmem:[%s5349_s4 + $0x10] sm:$0xff]  }
 0x1db   :  { %v4228_v13 = vsel %vm91_vm0, 0.0, %v1227_v54  ;;  %v4231_v53 = vsel %vm91_vm0, 0.0, %v1228_v23  ;;  %v4234_v34 = vsel %vm91_vm0, %v1227_v54, 0.0  ;;  %v4237_v40 = vsel %vm91_vm0, %v1228_v23, 0.0 }
 0x1dc   :  { %v3147_v43 = vpack.i.bf16 %v4231_v53, %v4228_v13  ;;  %v4242_v46 = vsel %vm91_vm0, 0.0, %v1226_v17  ;;  %v1363_v47 = vrot.slane %v4228_v13, 2  ;;  %v1364_v49 = vrot.slane %v4234_v34, 2  ;;  %2809 = vmatpush3.bf16.msra.mxu1 %v3391_v9 }
 0x1dd   :  { %v3152_v52 = vpack.i.bf16 %v4228_v13, %v4242_v46  ;;  %v1366_v39 = vrot.slane %v4231_v53, 2  ;;  %v1367_v58 = vrot.slane %v4237_v40, 2  ;;  %v4251_v45 = vsel %vm91_vm0, 0.0, %v1235_v44  ;;  %2810 = vmatprep.subr.bf16.mxu1 %v3392_v32 }
 0x1de   :  { %3148 = vrot.lane.b32.xlu1 %v3147_v43, %s3421_s11  ;;  %v4261_v0 = vsel %vm198_vm1, %v1363_v47, %v1364_v49  ;;  %v4264_v4 = vsel %vm91_vm0, 0.0, %v1236_v33  ;;  %v4267_v48 = vsel %vm91_vm0, %v1235_v44, 0.0  ;;  %v4270_v15 = vsel %vm91_vm0, %v1236_v33, 0.0 }
 0x1df   :  { %3153 = vrot.lane.b32.xlu0 %v3152_v52, %s3423_s23  ;;  %v4274_v37 = vsel %vm198_vm1, %v1366_v39, %v1367_v58  ;;  %v3167_v10 = vpack.i.bf16 %v4264_v4, %v4251_v45  ;;  %v4279_v29 = vsel %vm91_vm0, 0.0, %v1229_v7  ;;  %v4282_v42 = vsel %vm91_vm0, 0.0, %v1230_v12 }
 0x1e0   :  { %v1806_v36 = vpack.c.bf16 %v4274_v37, %v4261_v0  ;;  %v4287_v60 = vsel %vm91_vm0, %v1229_v7, 0.0  ;;  %v4290_v31 = vsel %vm91_vm0, %v1230_v12, 0.0  ;;  %v1369_v56 = vrot.slane %v4279_v29, 2  ;;  %2811 = vmatpush3.bf16.msra.mxu1 %v3393_v25 }
 0x1e1   :  { %v1370_v59 = vrot.slane %v4287_v60, 2  ;;  %v1372_v6 = vrot.slane %v4282_v42, 2  ;;  %v1373_v16 = vrot.slane %v4290_v31, 2  ;;  %v3157_v63 = vpack.i.bf16 %v4279_v29, %v4231_v53 }
 0x1e2   :  { %2898 = vmatprep.mubr.msk.bf16.mxu0 %vm566_vm3, %v1806_v36  ;;  %3168 = vrot.lane.b32.xlu1 %v3167_v10, %s3421_s11  ;;  %v1199_v3 = vmax.f32 %v1183_v20, 0.0  ;;  %v4303_v38 = vsel %vm91_vm0, %v1226_v17, 0.0  ;;  %v1360_v18 = vrot.slane %v4242_v46, 2  ;;  %v1185_v24 = vadd.f32 %v4180_v22, %v4198_v30 }
 0x1e3   :  { %v4307_v19 = vsel %vm198_vm1, %v1369_v56, %v1370_v59  ;;  %v4310_v5 = vsel %vm198_vm1, %v1372_v6, %v1373_v16  ;;  %3158 = vrot.lane.b32.xlu0 %v3157_v63, %s3423_s23  ;;  %v1361_v11 = vrot.slane %v4303_v38, 2  ;;  %v1200_v54 = vmax.f32 %v1184_v61, 0.0  ;;  %v3394_v6 = vld [vmem:[%s5349_s4 + $0x48] sm:$0xff]  }
 0x1e4   :  { %v1809_v28 = vpack.c.bf16 %v4310_v5, %v4307_v19  ;;  %v1231_v23 = vrot.slane %v1199_v3, 7  ;;  %v1191_v17 = vadd.f32 %v4180_v22, %v4221_v50  ;;  %v1201_v30 = vmax.f32 %v1185_v24, 0.0  ;;  %v3395_v16 = vld [vmem:[%s5349_s4 + $0x8] sm:$0xff]   ;;  %2812 = vmatprep.subr.bf16.mxu1 %v3394_v6 }
 0x1e5   :  { %v4327_v20 = vsel %vm198_vm1, %v1360_v18, %v1361_v11  ;;  %v1321_v44 = vrot.slane %v4228_v13, 1  ;;  %v1322_v33 = vrot.slane %v4234_v34, 1  ;;  %v1232_v7 = vrot.slane %v1200_v54, 7  ;;  %2813 = vmatpush3.bf16.msra.mxu1 %v3395_v16 }
 0x1e6   :  { %2899 = vmatmul.mubr.msk.bf16.vlgmr.msra.gmra.mxu0 %vm566_vm3, %v1809_v28  ;;  %v4333_v12 = vsel %vm91_vm0, 0.0, %v1231_v23  ;;  %v4336_v43 = vsel %vm91_vm0, %v1231_v23, 0.0  ;;  %v3172_v50 = vpack.i.bf16 %v4261_v0, %v4327_v20  ;;  %v1233_v52 = vrot.slane %v1201_v30, 7 }
 0x1e7   :  { %v1375_v47 = vrot.slane %v4333_v12, 2  ;;  %v1376_v49 = vrot.slane %v4336_v43, 2  ;;  %v3162_v34 = vpack.i.bf16 %v4333_v12, %v4282_v42  ;;  %v4345_v39 = vsel %vm91_vm0, 0.0, %v1232_v7 }
 0x1e8   :  { %v4348_v58 = vsel %vm91_vm0, %v1232_v7, 0.0  ;;  %3173 = vrot.lane.b32.xlu1 %v3172_v50, %s3422_s22  ;;  %v1207_v14 = vmax.f32 %v1191_v17, 0.0  ;;  %v4352_v9 = vsel %vm153_vm2, %v1321_v44, %v1322_v33  ;;  %v1378_v36 = vrot.slane %v4345_v39, 2 }
 0x1e9   :  { %v4355_v10 = vsel %vm198_vm1, %v1375_v47, %v1376_v49  ;;  %v1379_v56 = vrot.slane %v4348_v58, 2  ;;  %3163 = vrot.lane.b32.xlu0 %v3162_v34, %s3423_s23  ;;  %v4361_v59 = vsel %vm91_vm0, 0.0, %v1233_v52  ;;  %v4370_v63 = vsel %vm91_vm0, %v1233_v52, 0.0 }
 0x1ea   :  { %v1428_v61 = vrot.slane %v4361_v59, 2  ;;  %v4373_v3 = vrot.slane %v1207_v14, 7  ;;  %v1324_v18 = vrot.slane %v4231_v53, 1  ;;  %v1429_v24 = vrot.slane %v4370_v63, 2 }
 0x1eb   :  { %v4377_v11 = vsel %vm198_vm1, %v1378_v36, %v1379_v56  ;;  %v1325_v32 = vrot.slane %v4237_v40, 1  ;;  %v1384_v25 = vrot.slane %v4251_v45, 2  ;;  %v1385_v23 = vrot.slane %v4267_v48, 2  ;;  %v3396_v36 = vld [vmem:[%s5349_s4 + $0x40] sm:$0xff]  }
 0x1ec   :  { %v1812_v28 = vpack.c.bf16 %v4377_v11, %v4355_v10  ;;  %v4386_v54 = vsel %vm91_vm0, 0.0, %v4373_v3  ;;  %v1167_v17 = vmul.f32 %v4170_v27, %v4109_v55  ;;  %v4392_v30 = vsel %vm198_vm1, %v1428_v61, %v1429_v24  ;;  %v3397_v56 = vld [vmem:[%s5349_s4] sm:$0xff]   ;;  %2814 = vmatprep.subr.bf16.mxu1 %v3396_v36 }
 0x1ed   :  { %1558 = vrot.lane.b32.xlu0 %v4386_v54, %s3423_s23  ;;  %v4397_v40 = vsel %vm153_vm2, %v1324_v18, %v1325_v32  ;;  %v1387_v44 = vrot.slane %v4264_v4, 2  ;;  %v1388_v33 = vrot.slane %v4270_v15, 2  ;;  %v1815_v7 = vpack.c.bf16 %v3477_v8, %v4392_v30  ;;  %2815 = vmatpush3.bf16.msra.mxu1 %v3397_v56 }
 0x1ee   :  { %2902 = vmatprep.mubr.msk.bf16.mxu0 %vm566_vm3, %v1812_v28  ;;  %v3187_v55 = vpack.i.bf16 %v4397_v40, %v4352_v9  ;;  %v4407_v50 = vsel %vm198_vm1, %v1384_v25, %v1385_v23  ;;  %v1168_v47 = vmul.f32 %v4170_v27, %v4116_v2  ;;  %v1318_v34 = vrot.slane %v4242_v46, 1  ;;  %2914 = vmatprep.subr.bf16.mxu1 %v4029_v35 }
 0x1ef   :  { %v4412_v49 = vsel %vm198_vm1, %v1387_v44, %v1388_v33  ;;  %v1319_v52 = vrot.slane %v4303_v38, 1  ;;  %v1189_v14 = vadd.f32 %v4180_v22, %v1167_v17  ;;  %2903 = vmatmul.mubr.msk.bf16.gmra.mxu0 %vm566_vm3, %v1815_v7  ;;  %v3192_v61 = vpack.i.bf16 %v4352_v9, %v4307_v19 }
 0x1f0   :  { %3188 = vrot.lane.b32.xlu1 %v3187_v55, %s3423_s23  ;;  %v1818_v2 = vpack.c.bf16 %v4412_v49, %v4407_v50  ;;  %v1190_v6 = vadd.f32 %v4180_v22, %v1168_v47  ;;  %v1327_v32 = vrot.slane %v4279_v29, 1  ;;  %v1328_v28 = vrot.slane %v4287_v60, 1 }
 0x1f1   :  { %v4429_v38 = vsel %vm153_vm2, %v1318_v34, %v1319_v52  ;;  %v1205_v16 = vmax.f32 %v1189_v14, 0.0  ;;  %v1330_v23 = vrot.slane %v4282_v42, 1  ;;  %v1331_v17 = vrot.slane %v4290_v31, 1 }
 0x1f2   :  { %2906 = vmatprep.mubr.msk.bf16.mxu0 %vm566_vm3, %v1818_v2  ;;  %v3177_v18 = vpack.i.bf16 %v4274_v37, %v4429_v38  ;;  %v1206_v24 = vmax.f32 %v1190_v6, 0.0  ;;  %v3202_v60 = vpack.i.bf16 %v4261_v0, %v4282_v42  ;;  %v3182_v55 = vpack.i.bf16 %v4279_v29, %v4327_v20 }
 0x1f3   :  { %v1237_v25 = vrot.slane %v1205_v16, 7  ;;  %v4464_v36 = vsel %vm153_vm2, %v1327_v32, %v1328_v28  ;;  %v4467_v0 = vsel %vm153_vm2, %v1330_v23, %v1331_v17  ;;  %v1164_v2 = vmul.f32 %v4170_v27, %v4087_v62 }
 0x1f4   :  { %3193 = vrot.lane.b32.xlu1 %v3192_v61, %s3422_s22  ;;  %3178 = vrot.lane.b32.xlu0 %v3177_v18, %s3422_s22  ;;  %v1238_v44 = vrot.slane %v1206_v24, 7  ;;  %v3212_v16 = vpack.i.bf16 %v4467_v0, %v4464_v36  ;;  %v3197_v61 = vpack.i.bf16 %v4310_v5, %v4397_v40  ;;  %v4491_v62 = vsel %vm91_vm0, %v4373_v3, 0.0 }
 0x1f5   :  { %v4444_v33 = vsel %vm91_vm0, 0.0, %v1237_v25  ;;  %v4447_v7 = vsel %vm91_vm0, %v1237_v25, 0.0  ;;  %v1186_v18 = vadd.f32 %v4180_v22, %v1164_v2  ;;  %v3217_v32 = vpack.i.bf16 %v4464_v36, %v4355_v10 }
 0x1f6   :  { %v4454_v31 = vsel %vm91_vm0, 0.0, %v1238_v44  ;;  %v4457_v35 = vsel %vm91_vm0, %v1238_v44, 0.0  ;;  %v1390_v47 = vrot.slane %v4444_v33, 2  ;;  %v1391_v34 = vrot.slane %v4447_v7, 2 }
 0x1f7   :  { %v1393_v52 = vrot.slane %v4454_v31, 2  ;;  %v1394_v14 = vrot.slane %v4457_v35, 2  ;;  %v1202_v24 = vmax.f32 %v1186_v18, 0.0  ;;  %v3207_v25 = vpack.i.bf16 %v4333_v12, %v4274_v37 }
 0x1f8   :  { %v4470_v20 = vsel %vm198_vm1, %v1390_v47, %v1391_v34  ;;  %3203 = vrot.lane.b32.xlu1 %v3202_v60, %s3421_s11  ;;  %3183 = vrot.lane.b32.xlu0 %v3182_v55, %s3421_s11  ;;  %v1333_v28 = vrot.slane %v4333_v12, 1  ;;  %v1334_v23 = vrot.slane %v4336_v43, 1  ;;  %v1336_v17 = vrot.slane %v4345_v39, 1 }
 0x1f9   :  { %v4475_v56 = vsel %vm198_vm1, %v1393_v52, %v1394_v14  ;;  %v1337_v44 = vrot.slane %v4348_v58, 1  ;;  %v1234_v60 = vrot.slane %v1202_v24, 7  ;;  %v1396_v37 = vrot.slane %v4386_v54, 2 }
 0x1fa   :  { %v1821_v6 = vpack.c.bf16 %v4475_v56, %v4470_v20  ;;  %v1397_v47 = vrot.slane %v4491_v62, 2  ;;  %v1209_v43 = vmax.f32 %v4207_v26, 0.0  ;;  %v3227_v34 = vpack.i.bf16 %v4307_v19, %v4345_v39 }
 0x1fb   :  { %v4504_v3 = vsel %vm91_vm0, 0.0, %v1234_v60  ;;  %v1282_v55 = vsel %vm91_vm0, %v1234_v60, 0.0  ;;  %v3222_v58 = vpack.i.bf16 %v4377_v11, %v4467_v0  ;;  %v4515_v52 = vsel %vm153_vm2, %v1333_v28, %v1334_v23 }
 0x1fc   :  { %2907 = vmatmul.mubr.msk.bf16.gmra.mxu0 %vm566_vm3, %v1821_v6  ;;  %3213 = vrot.lane.b32.xlu1 %v3212_v16, %s3423_s23  ;;  %v4518_v14 = vsel %vm153_vm2, %v1336_v17, %v1337_v44  ;;  %v4521_v2 = vsel %vm198_vm1, %v1396_v37, %v1397_v47  ;;  %v1381_v6 = vrot.slane %v4504_v3, 2  ;;  %v1382_v26 = vrot.slane %v1282_v55, 2 }
 0x1fd   :  { %3198 = vrot.lane.b32.xlu0 %v3197_v61, %s3422_s22  ;;  %v3317_v19 = vpack.i.bf16 %v4521_v2, %v4475_v56  ;;  %v3237_v16 = vpack.i.bf16 %v4518_v14, %v4515_v52  ;;  %v1170_v61 = vmul.f32 %v4170_v27, %v4139_v57  ;;  %v1241_v18 = vrot.slane %v1209_v43, 7 }
 0x1fe   :  { %v3232_v24 = vpack.i.bf16 %v4361_v59, %v4310_v5  ;;  %v1383_v28 = vsel %vm198_vm1, %v1381_v6, %v1382_v26  ;;  %v3242_v5 = vpack.i.bf16 %v4515_v52, %v4392_v30  ;;  %v1343_v37 = vrot.slane %v4267_v48, 1 }
 0x1ff   :  { %v1192_v23 = vadd.f32 %v4180_v22, %v1170_v61  ;;  %v4540_v17 = vsel %vm91_vm0, 0.0, %v1241_v18  ;;  %v4546_v27 = vsel %vm91_vm0, %v1241_v18, 0.0  ;;  %v3247_v60 = vpack.i.bf16 %v1383_v28, %v4518_v14 }
 0x200   :  { %3218 = vrot.lane.b32.xlu1 %v3217_v32, %s3422_s22  ;;  %v1406_v32 = vrot.slane %v4361_v59, 1  ;;  %v3332_v57 = vpack.i.bf16 %v4540_v17, %v4475_v56  ;;  %v1339_v47 = vrot.slane %v4504_v3, 1  ;;  %v1340_v43 = vrot.slane %v1282_v55, 1 }
 0x201   :  { %3208 = vrot.lane.b32.xlu0 %v3207_v25, %s3421_s11  ;;  %v1407_v25 = vrot.slane %v4370_v63, 1  ;;  %v1342_v63 = vrot.slane %v4251_v45, 1  ;;  %v1208_v44 = vmax.f32 %v1192_v23, 0.0  ;;  %v1432_v30 = vrot.slane %v4546_v27, 2 }
 0x202   :  { %v3252_v6 = vpack.i.bf16 %v4377_v11, %v4355_v10  ;;  %v1345_v26 = vrot.slane %v4264_v4, 1  ;;  %v4577_v10 = vsel %vm153_vm2, %v1339_v47, %v1340_v43  ;;  %v3272_v43 = vpack.i.bf16 %v4444_v33, %v1383_v28 }
 0x203   :  { %v4553_v22 = vsel %vm153_vm2, %v1406_v32, %v1407_v25  ;;  %v4572_v18 = vsel %vm153_vm2, %v1342_v63, %v1343_v37  ;;  %v1349_v37 = vrot.slane %v4447_v7, 1  ;;  %v3297_v28 = vpack.i.bf16 %v4407_v50, %v4454_v31 }
 0x204   :  { %3228 = vrot.lane.b32.xlu1 %v3227_v34, %s3421_s11  ;;  %v1240_v34 = vrot.slane %v1208_v44, 7  ;;  %v3257_v55 = vpack.i.bf16 %v4345_v39, %v4553_v22  ;;  %v3262_v32 = vpack.i.bf16 %v4572_v18, %v4361_v59  ;;  %v1348_v59 = vrot.slane %v4444_v33, 1 }
 0x205   :  { %3223 = vrot.lane.b32.xlu0 %v3222_v58, %s3422_s22  ;;  %v1431_v58 = vrot.slane %v4540_v17, 2 }
 0x206   :  { %v4566_v48 = vsel %vm91_vm0, 0.0, %v1240_v34  ;;  %v1288_v61 = vsel %vm91_vm0, %v1240_v34, 0.0  ;;  %v4608_v34 = vsel %vm153_vm2, %v1348_v59, %v1349_v37 }
 0x207   :  { %v1400_v11 = vrot.slane %v1288_v61, 2  ;;  %v3282_v7 = vpack.i.bf16 %v4608_v34, %v4251_v45 }
 0x208   :  { %3238 = vrot.lane.b32.xlu1 %v3237_v16, %s3423_s23  ;;  %v1346_v16 = vrot.slane %v4270_v15, 1  ;;  %v4580_v15 = vsel %vm198_vm1, %v1431_v58, %v1432_v30  ;;  %v3287_v58 = vpack.i.bf16 %v4470_v20, %v4412_v49  ;;  %v1351_v30 = vrot.slane %v4454_v31, 1 }
 0x209   :  { %3233 = vrot.lane.b32.xlu0 %v3232_v24, %s3421_s11  ;;  %v1399_v24 = vrot.slane %v4566_v48, 2 }
 0x20a   :  { %v4586_v25 = vsel %vm153_vm2, %v1345_v26, %v1346_v16 }
 0x20b   :  { %v4589_v23 = vsel %vm198_vm1, %v1399_v24, %v1400_v11  ;;  %v3277_v47 = vpack.i.bf16 %v4504_v3, %v4586_v25  ;;  %v3292_v26 = vpack.i.bf16 %v4586_v25, %v4572_v18  ;;  %v1355_v24 = vrot.slane %v4491_v62, 1 }
 0x20c   :  { %3243 = vrot.lane.b32.xlu1 %v3242_v5, %s3422_s22  ;;  %v3267_v5 = vpack.i.bf16 %v4577_v10, %v4407_v50  ;;  %v3342_v63 = vpack.i.bf16 %v4580_v15, %v4589_v23  ;;  %v3352_v44 = vpack.i.bf16 %v4589_v23, %v4521_v2  ;;  %v3302_v50 = vpack.i.bf16 %v4386_v54, %v4412_v49 }
 0x20d   :  { %3248 = vrot.lane.b32.xlu0 %v3247_v60, %s3422_s22  ;;  %v1824_v60 = vpack.c.bf16 %v4589_v23, %v4521_v2  ;;  %v1357_v62 = vrot.slane %v4566_v48, 1  ;;  %v3327_v49 = vpack.i.bf16 %v4470_v20, %v4566_v48 }
 0x210   :  { %3253 = vrot.lane.b32.xlu1 %v3252_v6, %s3421_s11  ;;  %v1352_v6 = vrot.slane %v4457_v35, 1 }
 0x211   :  { %3258 = vrot.lane.b32.xlu0 %v3257_v55, %s3423_s23  ;;  %v1354_v55 = vrot.slane %v4386_v54, 1 }
 0x212   :  { %v4624_v16 = vsel %vm153_vm2, %v1351_v30, %v1352_v6 }
 0x213   :  { %v3307_v35 = vpack.i.bf16 %v4264_v4, %v4624_v16  ;;  %v4636_v11 = vsel %vm153_vm2, %v1354_v55, %v1355_v24  ;;  %v3322_v59 = vpack.i.bf16 %v4624_v16, %v4608_v34 }
 0x214   :  { %3263 = vrot.lane.b32.xlu1 %v3262_v32, %s3423_s23  ;;  %v3312_v32 = vpack.i.bf16 %v4636_v11, %v4444_v33 }
 0x215   :  { %3268 = vrot.lane.b32.xlu0 %v3267_v5, %s3422_s22  ;;  %v1358_v5 = vrot.slane %v1288_v61, 1 }
 0x217   :  { %v4652_v37 = vsel %vm153_vm2, %v1357_v62, %v1358_v5 }
 0x218   :  { %3278 = vrot.lane.b32.xlu1 %v3277_v47, %s3423_s23  ;;  %v3337_v61 = vpack.i.bf16 %v4454_v31, %v4652_v37  ;;  %v1410_v47 = vrot.slane %v4546_v27, 1  ;;  %v3347_v20 = vpack.i.bf16 %v4652_v37, %v4636_v11 }
 0x219   :  { %3273 = vrot.lane.b32.xlu0 %v3272_v43, %s3421_s11 }
 0x21c   :  { %3288 = vrot.lane.b32.xlu1 %v3287_v58, %s3422_s22 }
 0x21d   :  { %3283 = vrot.lane.b32.xlu0 %v3282_v7, %s3423_s23 }
 0x220   :  { %3298 = vrot.lane.b32.xlu1 %v3297_v28, %s3421_s11 }
 0x221   :  { %3293 = vrot.lane.b32.xlu0 %v3292_v26, %s3422_s22 }
 0x224   :  { %3308 = vrot.lane.b32.xlu1 %v3307_v35, %s3423_s23 }
 0x225   :  { %3303 = vrot.lane.b32.xlu0 %v3302_v50, %s3421_s11 }
 0x228   :  { %3318 = vrot.lane.b32.xlu1 %v3317_v19, %s3422_s22  ;;  %v1409_v19 = vrot.slane %v4540_v17, 1 }
 0x229   :  { %3313 = vrot.lane.b32.xlu0 %v3312_v32, %s3423_s23 }
 0x22a   :  { %v4669_v43 = vsel %vm153_vm2, %v1409_v19, %v1410_v47 }
 0x22b   :  { %v3357_v58 = vpack.i.bf16 %v4566_v48, %v4669_v43 }
 0x22c   :  { %3328 = vrot.lane.b32.xlu1 %v3327_v49, %s3421_s11 }
 0x22d   :  { %3323 = vrot.lane.b32.xlu0 %v3322_v59, %s3422_s22 }
 0x230   :  { %3338 = vrot.lane.b32.xlu1 %v3337_v61, %s3423_s23 }
 0x231   :  { %3333 = vrot.lane.b32.xlu0 %v3332_v57, %s3421_s11 }
 0x234   :  { %3343 = vrot.lane.b32.xlu1 %v3342_v63, %s3422_s22 }
 0x235   :  { %3348 = vrot.lane.b32.xlu0 %v3347_v20, %s3422_s22 }
 0x238   :  { %3353 = vrot.lane.b32.xlu1 %v3352_v44, %s3421_s11 }
 0x239   :  { %3358 = vrot.lane.b32.xlu0 %v3357_v58, %s3423_s23 }
 0x23c   :  { %1562 = vrot.lane.b32.xlu1 %v4540_v17, %s3423_s23 }
 0x250   :  { %v3149_v56 = vpop.permute.xlu1 %3148 }
 0x251   :  { %v3154_v57 = vpop.permute.xlu0 %3153  ;;  %v3151_v17 = vunpack.i.h.bf16 %v3149_v56  ;;  %v3150_v24 = vunpack.i.l.bf16 %v3149_v56 }
 0x252   :  { %v3155_v20 = vunpack.i.l.bf16 %v3154_v57 }
 0x254   :  { %v4678_v27 = vpop.permute.xlu1 %3168 }
 0x255   :  { %v4680_v63 = vpop.permute.xlu0 %3158 }
 0x25a   :  { %v3174_v7 = vpop.permute.xlu1 %3173 }
 0x25b   :  { %v4682_v30 = vpop.permute.xlu0 %3163  ;;  %v3176_v6 = vunpack.i.h.bf16 %v3174_v7  ;;  %v3175_v28 = vunpack.i.l.bf16 %v3174_v7 }
 0x25d   :  { %v1757_v44 = vsel %vm566_vm3, %v4352_v9, %v3176_v6  ;;  %v1756_v55 = vsel %vm566_vm3, %v4429_v38, %v3175_v28  ;;  %v3156_v28 = vunpack.i.h.bf16 %v3154_v57 }
 0x25e   :  { %v1772_v62 = vsel %vm582_vm4, %v1756_v55, %v3150_v24  ;;  %v1773_v5 = vsel %vm582_vm4, %v1757_v44, %v3151_v17 }
 0x25f   :  { %v4684_v26 = vpop.permute.xlu0 %1558 }
 0x262   :  { %v3189_v35 = vpop.permute.xlu1 %3188 }
 0x263   :  { %v3191_v50 = vunpack.i.h.bf16 %v3189_v35  ;;  %v3190_v32 = vunpack.i.l.bf16 %v3189_v35  ;;  %v1740_v35 = vsel %vm598_vm5, %v3894_v21, %v3155_v20 }
 0x265   :  { %v1788_v49 = vsel %vm598_vm5, %v1772_v62, %v3190_v32  ;;  %v1789_v59 = vsel %vm598_vm5, %v1773_v5, %v3191_v50 }
 0x266   :  { %v3194_v61 = vpop.permute.xlu1 %3193  ;;  %v3179_v19 = vpop.permute.xlu0 %3178  ;;  %v1805_v47 = vpack.c.bf16 %v1789_v59, %v1788_v49 }
 0x267   :  { %v3180_v9 = vunpack.i.l.bf16 %v3179_v19  ;;  %v3195_v38 = vunpack.i.l.bf16 %v3194_v61  ;;  %v3181_v7 = vunpack.i.h.bf16 %v3179_v19  ;;  %v3196_v50 = vunpack.i.h.bf16 %v3194_v61 }
 0x268   :  { %2028 = vmatprep.mubr.bf16.mxu1 %v1805_v47 }
 0x269   :  { %v1712_v55 = vsel %vm566_vm3, %v4242_v46, %v3180_v9  ;;  %v1759_v32 = vsel %vm566_vm3, %v4464_v36, %v3195_v38  ;;  %v1758_v57 = vsel %vm566_vm3, %v4397_v40, %v3181_v7  ;;  %v3402_v40 = vld [vmem:[%s5349_s4 + $0x88] sm:$0xff]  }
 0x26a   :  { %v3204_v58 = vpop.permute.xlu1 %3203  ;;  %v3184_v56 = vpop.permute.xlu0 %3183 }
 0x26b   :  { %v3185_v6 = vunpack.i.l.bf16 %v3184_v56  ;;  %v3205_v44 = vunpack.i.l.bf16 %v3204_v58  ;;  %v3186_v17 = vunpack.i.h.bf16 %v3184_v56  ;;  %v3206_v47 = vunpack.i.h.bf16 %v3204_v58 }
 0x26c   :  { %v1713_v58 = vsel %vm566_vm3, %v4228_v13, %v3196_v50 }
 0x26d   :  { %v1726_v24 = vsel %vm582_vm4, %v1712_v55, %v3185_v6  ;;  %v1775_v9 = vsel %vm582_vm4, %v1759_v32, %v3205_v44  ;;  %v1774_v56 = vsel %vm582_vm4, %v1758_v57, %v3186_v17  ;;  %v1727_v55 = vsel %vm582_vm4, %v1713_v58, %v3206_v47 }
 0x26e   :  { %v1741_v62 = vsel %vm598_vm5, %v1726_v24, %v3156_v28  ;;  %v3214_v5 = vpop.permute.xlu1 %3213  ;;  %v3403_v28 = vld [vmem:[%s5349_s4 + $0x80] sm:$0xff]   ;;  %v3161_v17 = vunpack.i.h.bf16 %v4680_v63  ;;  %v3160_v24 = vunpack.i.l.bf16 %v4680_v63 }
 0x26f   :  { %v1804_v49 = vpack.c.bf16 %v1741_v62, %v1740_v35  ;;  %v3216_v59 = vunpack.i.h.bf16 %v3214_v5  ;;  %v3215_v46 = vunpack.i.l.bf16 %v3214_v5  ;;  %v3199_v19 = vpop.permute.xlu0 %3198 }
 0x270   :  { %v3200_v20 = vunpack.i.l.bf16 %v3199_v19  ;;  %v3201_v32 = vunpack.i.h.bf16 %v3199_v19 }
 0x271   :  { %2029 = vmatmul.mubr.bf16.vlgmr.msra.gmra.mxu1 %v1804_v49  ;;  %v1790_v61 = vsel %vm598_vm5, %v1774_v56, %v3215_v46  ;;  %v1791_v36 = vsel %vm598_vm5, %v1775_v9, %v3216_v59  ;;  %v1742_v49 = vsel %vm598_vm5, %v1727_v55, %v3160_v24 }
 0x272   :  { %v3219_v38 = vpop.permute.xlu1 %3218  ;;  %v1808_v6 = vpack.c.bf16 %v1791_v36, %v1790_v61  ;;  %2916 = vmatpush3.bf16.msra.mxu1 %v3402_v40  ;;  %v1714_v35 = vsel %vm566_vm3, %v4231_v53, %v3200_v20  ;;  %v3166_v61 = vunpack.i.h.bf16 %v4682_v30  ;;  %v1760_v53 = vsel %vm566_vm3, %v4467_v0, %v3201_v32 }
 0x273   :  { %v3209_v7 = vpop.permute.xlu0 %3208  ;;  %2915 = vmatprep.subr.bf16.mxu1 %v3403_v28  ;;  %v3221_v62 = vunpack.i.h.bf16 %v3219_v38  ;;  %v3220_v5 = vunpack.i.l.bf16 %v3219_v38  ;;  %v3165_v0 = vunpack.i.l.bf16 %v4682_v30 }
 0x274   :  { %v3210_v44 = vunpack.i.l.bf16 %v3209_v7  ;;  %2036 = vmatprep.mubr.bf16.mxu1 %v1808_v6  ;;  %v3211_v46 = vunpack.i.h.bf16 %v3209_v7 }
 0x275   :  { %v1715_v20 = vsel %vm566_vm3, %v4279_v29, %v3221_v62  ;;  %v1761_v36 = vsel %vm566_vm3, %v4515_v52, %v3220_v5 }
 0x276   :  { %v1728_v13 = vsel %vm582_vm4, %v1714_v35, %v3210_v44  ;;  %v3229_v50 = vpop.permute.xlu1 %3228  ;;  %2917 = vmatpush3.bf16.msra.mxu1 %v3403_v28  ;;  %v1776_v58 = vsel %vm582_vm4, %v1760_v53, %v3211_v46 }
 0x277   :  { %v3224_v57 = vpop.permute.xlu0 %3223  ;;  %v1743_v59 = vsel %vm598_vm5, %v1728_v13, %v3161_v17  ;;  %v3231_v47 = vunpack.i.h.bf16 %v3229_v50  ;;  %v3230_v9 = vunpack.i.l.bf16 %v3229_v50 }
 0x278   :  { %v1807_v56 = vpack.c.bf16 %v1743_v59, %v1742_v49  ;;  %v3225_v63 = vunpack.i.l.bf16 %v3224_v57  ;;  %v3226_v5 = vunpack.i.h.bf16 %v3224_v57 }
 0x279   :  { %v1729_v7 = vsel %vm582_vm4, %v1715_v20, %v3231_v47  ;;  %v1777_v28 = vsel %vm582_vm4, %v1761_v36, %v3230_v9 }
 0x27a   :  { %2037 = vmatmul.mubr.bf16.gmra.mxu1 %v1807_v56  ;;  %v3239_v19 = vpop.permute.xlu1 %3238  ;;  %v1716_v44 = vsel %vm566_vm3, %v4282_v42, %v3225_v63  ;;  %v1744_v50 = vsel %vm598_vm5, %v1729_v7, %v3165_v0  ;;  %v1762_v53 = vsel %vm566_vm3, %v4518_v14, %v3226_v5 }
 0x27b   :  { %v3241_v38 = vunpack.i.h.bf16 %v3239_v19  ;;  %v3240_v6 = vunpack.i.l.bf16 %v3239_v19  ;;  %v3234_v40 = vpop.permute.xlu0 %3233 }
 0x27c   :  { %v3235_v55 = vunpack.i.l.bf16 %v3234_v40  ;;  %v3236_v49 = vunpack.i.h.bf16 %v3234_v40 }
 0x27d   :  { %v1792_v29 = vsel %vm598_vm5, %v1776_v58, %v3240_v6  ;;  %v1793_v17 = vsel %vm598_vm5, %v1777_v28, %v3241_v38 }
 0x27e   :  { %v1730_v52 = vsel %vm582_vm4, %v1716_v44, %v3235_v55  ;;  %v3244_v24 = vpop.permute.xlu1 %3243  ;;  %v1811_v35 = vpack.c.bf16 %v1793_v17, %v1792_v29  ;;  %v1778_v19 = vsel %vm582_vm4, %v1762_v53, %v3236_v49 }
 0x27f   :  { %v3245_v32 = vunpack.i.l.bf16 %v3244_v24  ;;  %v3249_v13 = vpop.permute.xlu0 %3248  ;;  %v1745_v62 = vsel %vm598_vm5, %v1730_v52, %v3166_v61  ;;  %v3246_v59 = vunpack.i.h.bf16 %v3244_v24  ;;  %v3171_v24 = vunpack.i.h.bf16 %v4678_v27 }
 0x280   :  { %2044 = vmatprep.mubr.bf16.mxu1 %v1811_v35  ;;  %v1810_v30 = vpack.c.bf16 %v1745_v62, %v1744_v50  ;;  %v3250_v47 = vunpack.i.l.bf16 %v3249_v13  ;;  %v3251_v36 = vunpack.i.h.bf16 %v3249_v13  ;;  %v3170_v35 = vunpack.i.l.bf16 %v4678_v27 }
 0x281   :  { %v1763_v42 = vsel %vm566_vm3, %v4553_v22, %v3245_v32  ;;  %v1717_v20 = vsel %vm566_vm3, %v4333_v12, %v3246_v59 }
 0x282   :  { %2045 = vmatmul.mubr.bf16.gmra.mxu1 %v1810_v30  ;;  %v3254_v46 = vpop.permute.xlu1 %3253  ;;  %v1779_v63 = vsel %vm582_vm4, %v1763_v42, %v3940_v41  ;;  %v1718_v14 = vsel %vm566_vm3, %v4345_v39, %v3250_v47  ;;  %v1764_v12 = vsel %vm566_vm3, %v4577_v10, %v3251_v36 }
 0x283   :  { %v3255_v9 = vunpack.i.l.bf16 %v3254_v46  ;;  %v3259_v56 = vpop.permute.xlu0 %3258  ;;  %v3256_v61 = vunpack.i.h.bf16 %v3254_v46  ;;  %v1795_v58 = vsel %vm598_vm5, %v1779_v63, %v3950_v51  ;;  %v1780_v10 = vsel %vm582_vm4, %v1764_v12, %v3170_v35 }
 0x284   :  { %v3260_v57 = vunpack.i.l.bf16 %v3259_v56  ;;  %v3261_v22 = vunpack.i.h.bf16 %v3259_v56 }
 0x285   :  { %v1731_v38 = vsel %vm582_vm4, %v1717_v20, %v3255_v9  ;;  %v1732_v0 = vsel %vm582_vm4, %v1718_v14, %v3256_v61 }
 0x286   :  { %v3264_v6 = vpop.permute.xlu1 %3263  ;;  %v1794_v40 = vsel %vm598_vm5, %v1778_v19, %v3260_v57  ;;  %v1746_v17 = vsel %vm598_vm5, %v1731_v38, %v3261_v22 }
 0x287   :  { %v3265_v7 = vunpack.i.l.bf16 %v3264_v6  ;;  %v3269_v28 = vpop.permute.xlu0 %3268  ;;  %v1814_v55 = vpack.c.bf16 %v1795_v58, %v1794_v40  ;;  %v3266_v29 = vunpack.i.h.bf16 %v3264_v6 }
 0x288   :  { %v3270_v44 = vunpack.i.l.bf16 %v3269_v28  ;;  %v3271_v5 = vunpack.i.h.bf16 %v3269_v28 }
 0x289   :  { %2052 = vmatprep.mubr.bf16.mxu1 %v1814_v55  ;;  %v1747_v52 = vsel %vm598_vm5, %v1732_v0, %v3265_v7  ;;  %v1796_v59 = vsel %vm598_vm5, %v1780_v10, %v3266_v29 }
 0x28a   :  { %v1765_v39 = vsel %vm566_vm3, %v4572_v18, %v3270_v44  ;;  %v3279_v32 = vpop.permute.xlu1 %3278  ;;  %v1813_v13 = vpack.c.bf16 %v1747_v52, %v1746_v17  ;;  %v1719_v56 = vsel %vm566_vm3, %v4504_v3, %v3271_v5 }
 0x28b   :  { %v3280_v50 = vunpack.i.l.bf16 %v3279_v32  ;;  %v3274_v62 = vpop.permute.xlu0 %3273  ;;  %v1781_v30 = vsel %vm582_vm4, %v1765_v39, %v3171_v24  ;;  %v3281_v46 = vunpack.i.h.bf16 %v3279_v32 }
 0x28c   :  { %2053 = vmatmul.mubr.bf16.gmra.mxu1 %v1813_v13  ;;  %v3275_v49 = vunpack.i.l.bf16 %v3274_v62  ;;  %v3276_v6 = vunpack.i.h.bf16 %v3274_v62 }
 0x28d   :  { %v1797_v42 = vsel %vm598_vm5, %v1781_v30, %v3280_v50  ;;  %v1748_v57 = vsel %vm598_vm5, %v3894_v21, %v3281_v46 }
 0x28e   :  { %v3289_v27 = vpop.permute.xlu1 %3288  ;;  %v1817_v47 = vpack.c.bf16 %v1797_v42, %v1796_v59  ;;  %v1733_v53 = vsel %vm582_vm4, %v1719_v56, %v3275_v49 }
 0x28f   :  { %v3290_v9 = vunpack.i.l.bf16 %v3289_v27  ;;  %v3284_v18 = vpop.permute.xlu0 %3283  ;;  %v3291_v20 = vunpack.i.h.bf16 %v3289_v27 }
 0x290   :  { %v3285_v63 = vunpack.i.l.bf16 %v3284_v18  ;;  %2060 = vmatprep.mubr.bf16.mxu1 %v1817_v47  ;;  %v3286_v28 = vunpack.i.h.bf16 %v3284_v18 }
 0x291   :  { %v1766_v36 = vsel %vm566_vm3, %v4586_v25, %v3290_v9  ;;  %v1767_v7 = vsel %vm566_vm3, %v4608_v34, %v3291_v20 }
 0x292   :  { %v3299_v61 = vpop.permute.xlu1 %3298  ;;  %v1749_v19 = vsel %vm598_vm5, %v1733_v53, %v3285_v63  ;;  %v1782_v14 = vsel %vm582_vm4, %v1766_v36, %v3276_v6 }
 0x293   :  { %v3294_v22 = vpop.permute.xlu0 %3293  ;;  %v1816_v38 = vpack.c.bf16 %v1749_v19, %v1748_v57  ;;  %v3300_v40 = vunpack.i.l.bf16 %v3299_v61  ;;  %v3301_v12 = vunpack.i.h.bf16 %v3299_v61  ;;  %v1798_v29 = vsel %vm598_vm5, %v1782_v14, %v3286_v28 }
 0x294   :  { %v3295_v3 = vunpack.i.l.bf16 %v3294_v22  ;;  %v3296_v44 = vunpack.i.h.bf16 %v3294_v22 }
 0x295   :  { %2061 = vmatmul.mubr.bf16.gmra.mxu1 %v1816_v38  ;;  %v1783_v0 = vsel %vm582_vm4, %v1767_v7, %v3300_v40 }
 0x296   :  { %v3309_v58 = vpop.permute.xlu1 %3308  ;;  %v1720_v52 = vsel %vm566_vm3, %v4251_v45, %v3295_v3  ;;  %v1721_v13 = vsel %vm566_vm3, %v4264_v4, %v3296_v44 }
 0x297   :  { %v3310_v21 = vunpack.i.l.bf16 %v3309_v58  ;;  %v3304_v55 = vpop.permute.xlu0 %3303  ;;  %v3311_v24 = vunpack.i.h.bf16 %v3309_v58  ;;  %v1734_v5 = vsel %vm582_vm4, %v1720_v52, %v3301_v12 }
 0x298   :  { %v3305_v25 = vunpack.i.l.bf16 %v3304_v55  ;;  %v3306_v27 = vunpack.i.h.bf16 %v3304_v55 }
 0x299   :  { %v1799_v17 = vsel %vm598_vm5, %v1783_v0, %v3310_v21  ;;  %v1750_v30 = vsel %vm598_vm5, %v1734_v5, %v3311_v24 }
 0x29a   :  { %v3319_v35 = vpop.permute.xlu1 %3318  ;;  %v1820_v39 = vpack.c.bf16 %v1799_v17, %v1798_v29  ;;  %v1735_v62 = vsel %vm582_vm4, %v1721_v13, %v3305_v25 }
 0x29b   :  { %v3320_v32 = vunpack.i.l.bf16 %v3319_v35  ;;  %v3314_v34 = vpop.permute.xlu0 %3313  ;;  %v3321_v45 = vunpack.i.h.bf16 %v3319_v35 }
 0x29c   :  { %v3315_v50 = vunpack.i.l.bf16 %v3314_v34  ;;  %2068 = vmatprep.mubr.bf16.mxu1 %v1820_v39  ;;  %v3316_v57 = vunpack.i.h.bf16 %v3314_v34 }
 0x29d   :  { %v1768_v59 = vsel %vm566_vm3, %v4624_v16, %v3320_v32  ;;  %v1769_v61 = vsel %vm566_vm3, %v4636_v11, %v3321_v45 }
 0x29e   :  { %v3329_v10 = vpop.permute.xlu1 %3328  ;;  %v1751_v49 = vsel %vm598_vm5, %v1735_v62, %v3315_v50  ;;  %v1784_v53 = vsel %vm582_vm4, %v1768_v59, %v3306_v27 }
 0x29f   :  { %v3324_v42 = vpop.permute.xlu0 %3323  ;;  %v1819_v46 = vpack.c.bf16 %v1751_v49, %v1750_v30  ;;  %v3331_v47 = vunpack.i.h.bf16 %v3329_v10  ;;  %v3330_v4 = vunpack.i.l.bf16 %v3329_v10 }
 0x2a0   :  { %v3325_v9 = vunpack.i.l.bf16 %v3324_v42  ;;  %v3326_v18 = vunpack.i.h.bf16 %v3324_v42 }
 0x2a1   :  { %2069 = vmatmul.mubr.bf16.gmra.mxu1 %v1819_v46  ;;  %v1785_v36 = vsel %vm582_vm4, %v1769_v61, %v3330_v4 }
 0x2a2   :  { %v1722_v56 = vsel %vm566_vm3, %v4444_v33, %v3325_v9  ;;  %v3339_v63 = vpop.permute.xlu1 %3338  ;;  %v1723_v6 = vsel %vm566_vm3, %v4454_v31, %v3326_v18  ;;  %v1800_v33 = vsel %vm598_vm5, %v1784_v53, %v3316_v57 }
 0x2a3   :  { %v3341_v19 = vunpack.i.h.bf16 %v3339_v63  ;;  %v3340_v16 = vunpack.i.l.bf16 %v3339_v63  ;;  %v3334_v20 = vpop.permute.xlu0 %3333  ;;  %v1736_v38 = vsel %vm582_vm4, %v1722_v56, %v3331_v47 }
 0x2a4   :  { %v3335_v22 = vunpack.i.l.bf16 %v3334_v20  ;;  %v3336_v17 = vunpack.i.h.bf16 %v3334_v20 }
 0x2a5   :  { %v1801_v40 = vsel %vm598_vm5, %v1785_v36, %v3340_v16  ;;  %v1752_v3 = vsel %vm598_vm5, %v1736_v38, %v3341_v19 }
 0x2a6   :  { %v1737_v11 = vsel %vm582_vm4, %v1723_v6, %v3335_v22  ;;  %v3344_v58 = vpop.permute.xlu1 %3343  ;;  %v1823_v14 = vpack.c.bf16 %v1801_v40, %v1800_v33  ;;  %v2900_v56 = vpop.f32.mrf.mxu0 }
 0x2a7   :  { %v3346_v7 = vunpack.i.h.bf16 %v3344_v58  ;;  %v3345_v28 = vunpack.i.l.bf16 %v3344_v58  ;;  %v3349_v21 = vpop.permute.xlu0 %3348  ;;  %v1753_v55 = vsel %vm598_vm5, %v1737_v11, %v4684_v26 }
 0x2a8   :  { %v3351_v0 = vunpack.i.h.bf16 %v3349_v21  ;;  %v3350_v44 = vunpack.i.l.bf16 %v3349_v21  ;;  %2076 = vmatprep.mubr.bf16.mxu1 %v1823_v14  ;;  %v1822_v31 = vpack.c.bf16 %v1753_v55, %v1752_v3  ;;  %v2127_v2 = vpop.f32.mrf.mxu0 }
 0x2a9   :  { %v1771_v12 = vsel %vm566_vm3, %v4669_v43, %v3346_v7  ;;  %v1770_v25 = vsel %vm566_vm3, %v4652_v37, %v3345_v28 }
 0x2aa   :  { %2077 = vmatmul.mubr.bf16.gmra.mxu1 %v1822_v31  ;;  %v3354_v29 = vpop.permute.xlu1 %3353  ;;  %v1787_v39 = vsel %vm582_vm4, %v1771_v12, %v3940_v41  ;;  %v1724_v26 = vsel %vm566_vm3, %v4386_v54, %v3350_v44  ;;  %v1725_v43 = vsel %vm566_vm3, %v4566_v48, %v3351_v0  ;;  %v1786_v50 = vsel %vm582_vm4, %v1770_v25, %v3336_v17  ;;  %v2901_v53 = vpop.f32.mrf.mxu0 }
 0x2ab   :  { %v3356_v52 = vunpack.i.h.bf16 %v3354_v29  ;;  %v3355_v24 = vunpack.i.l.bf16 %v3354_v29  ;;  %v3359_v35 = vpop.permute.xlu0 %3358  ;;  %v1803_v41 = vsel %vm598_vm5, %v1787_v39, %v3950_v51  ;;  %v1827_v48 = vpack.c.bf16 %v3477_v8, %v4580_v15 }
 0x2ac   :  { %v3361_v32 = vunpack.i.h.bf16 %v3359_v35  ;;  %v3360_v34 = vunpack.i.l.bf16 %v3359_v35  ;;  %v2130_v15 = vpop.f32.mrf.mxu0 }
 0x2ad   :  { %v1738_v13 = vsel %vm582_vm4, %v1724_v26, %v3355_v24  ;;  %v1739_v37 = vsel %vm582_vm4, %v1725_v43, %v3356_v52 }
 0x2ae   :  { %v1563_v62 = vpop.permute.xlu1 %1562  ;;  %v1754_v5 = vsel %vm598_vm5, %v1738_v13, %v3361_v32  ;;  %v1802_v10 = vsel %vm598_vm5, %v1786_v50, %v3360_v34 }
 0x2af   :  { %v1755_v54 = vsel %vm598_vm5, %v1739_v37, %v1563_v62  ;;  %v1826_v30 = vpack.c.bf16 %v1803_v41, %v1802_v10  ;;  %v2904_v16 = vpop.f32.mrf.mxu0 }
 0x2b0   :  { %v1825_v49 = vpack.c.bf16 %v1755_v54, %v1754_v5 }
 0x2b1   :  { %2084 = vmatprep.mubr.bf16.mxu1 %v1826_v30  ;;  %v2143_v36 = vpop.f32.mrf.mxu0 }
 0x2b2   :  { %2085 = vmatmul.mubr.bf16.gmra.mxu1 %v1825_v49 }
 0x2b3   :  { %2910 = vmatprep.mubr.msk.bf16.mxu1 %vm566_vm3, %v1824_v60  ;;  %v2905_v38 = vpop.f32.mrf.mxu0 }
 0x2b5   :  { %v2146_v58 = vpop.f32.mrf.mxu0 }
 0x2ba   :  { %2911 = vmatmul.mubr.msk.bf16.vlgmr.msra.gmra.mxu1 %vm566_vm3, %v1827_v48 }
 0x2bc   :  { %v2908_v31 = vpop.f32.mrf.mxu0 }
 0x2be   :  { %v2159_v32 = vpop.f32.mrf.mxu0 }
 0x331   :  { %v2816_v45 = vpop.f32.mrf.mxu1 }
 0x333   :  { %v2817_v59 = vpop.f32.mrf.mxu1 }
 0x334   :  { %v2818_v40 = vadd.f32 %v2817_v59, %v2816_v45 }
 0x335   :  { %v2819_v42 = vpop.f32.mrf.mxu1 }
 0x336   :  { %v4836_v21 = vadd.f32 %v2818_v40, %v2127_v2 }
 0x337   :  { %v2820_v51 = vpop.f32.mrf.mxu1 }
 0x338   :  { %v2821_v6 = vadd.f32 %v2820_v51, %v2819_v42  ;;  %v2229_v52 = vmul.f32 %v4836_v21, %v4836_v21  ;;  %v2192_v34 = vsel %vm566_vm3, %v4836_v21, 0.0  ;;  %v2909_v42 = vpop.f32.mrf.mxu0 }
 0x33a   :  { %v2822_v46 = vpop.f32.mrf.mxu1  ;;  %v4834_v7 = vadd.f32 %v2821_v6, %v2130_v15  ;;  %v2245_v10 = vsel %vm566_vm3, %v2229_v52, 0.0 }
 0x33c   :  { %v2823_v27 = vpop.f32.mrf.mxu1  ;;  %v2230_v25 = vmul.f32 %v4834_v7, %v4834_v7  ;;  %v2193_v35 = vsel %vm566_vm3, %v4834_v7, 0.0 }
 0x33d   :  { %v2824_v3 = vadd.f32 %v2823_v27, %v2822_v46  ;;  %v2194_v41 = vadd.f32 %v2193_v35, %v2192_v34 }
 0x33e   :  { %v2825_v47 = vpop.f32.mrf.mxu1  ;;  %v2246_v37 = vsel %vm566_vm3, %v2230_v25, 0.0 }
 0x33f   :  { %v4838_v0 = vadd.f32 %v2900_v56, %v2824_v3  ;;  %v2247_v51 = vadd.f32 %v2246_v37, %v2245_v10 }
 0x340   :  { %v2826_v4 = vpop.f32.mrf.mxu1 }
 0x341   :  { %v2827_v14 = vadd.f32 %v2826_v4, %v2825_v47  ;;  %v2231_v39 = vmul.f32 %v4838_v0, %v4838_v0  ;;  %v2195_v50 = vsel %vm566_vm3, %v4838_v0, 0.0 }
 0x342   :  { %v2828_v9 = vpop.f32.mrf.mxu1  ;;  %v2196_v46 = vadd.f32 %v2195_v50, %v2194_v41 }
 0x343   :  { %v4840_v12 = vadd.f32 %v2901_v53, %v2827_v14  ;;  %v2248_v49 = vsel %vm566_vm3, %v2231_v39, 0.0 }
 0x344   :  { %v2829_v18 = vpop.f32.mrf.mxu1 }
 0x345   :  { %v2830_v55 = vadd.f32 %v2829_v18, %v2828_v9  ;;  %v2232_v43 = vmul.f32 %v4840_v12, %v4840_v12  ;;  %v2197_v48 = vsel %vm566_vm3, %v4840_v12, 0.0 }
 0x346   :  { %v2831_v63 = vpop.f32.mrf.mxu1  ;;  %v2198_v2 = vadd.f32 %v2197_v48, %v2196_v46 }
 0x347   :  { %v4846_v24 = vadd.f32 %v2830_v55, %v2143_v36  ;;  %v2250_v27 = vsel %vm566_vm3, %v2232_v43, 0.0 }
 0x348   :  { %v2832_v23 = vpop.f32.mrf.mxu1 }
 0x349   :  { %v2833_v29 = vadd.f32 %v2832_v23, %v2831_v63  ;;  %v2233_v54 = vmul.f32 %v4846_v24, %v4846_v24  ;;  %v2199_v4 = vsel %vm566_vm3, %v4846_v24, 0.0  ;;  %v2249_v63 = vadd.f32 %v2248_v49, %v2247_v51 }
 0x34b   :  { %v4861_v62 = vadd.f32 %v2833_v29, %v2146_v58  ;;  %v2252_v23 = vsel %vm566_vm3, %v2233_v54, 0.0 }
 0x34c   :  { %v2834_v60 = vpop.f32.mrf.mxu1 }
 0x34d   :  { %v2234_v9 = vmul.f32 %v4861_v62, %v4861_v62  ;;  %v2201_v53 = vsel %vm566_vm3, %v4861_v62, 0.0 }
 0x34e   :  { %v2835_v61 = vpop.f32.mrf.mxu1 }
 0x34f   :  { %v2836_v26 = vadd.f32 %v2835_v61, %v2834_v60 }
 0x350   :  { %v2837_v8 = vpop.f32.mrf.mxu1 }
 0x351   :  { %v4869_v45 = vadd.f32 %v2904_v16, %v2836_v26  ;;  %v2200_v16 = vadd.f32 %v2199_v4, %v2198_v2 }
 0x352   :  { %v2838_v57 = vpop.f32.mrf.mxu1 }
 0x353   :  { %v2839_v5 = vadd.f32 %v2838_v57, %v2837_v8  ;;  %v2235_v61 = vmul.f32 %v4869_v45, %v4869_v45  ;;  %v2162_v57 = vpop.f32.mrf.mxu0  ;;  %v2202_v3 = vadd.f32 %v2201_v53, %v2200_v16 }
 0x355   :  { %v2840_v19 = vpop.f32.mrf.mxu1  ;;  %v4876_v18 = vadd.f32 %v2905_v38, %v2839_v5  ;;  %v2203_v38 = vsel %vm566_vm3, %v4869_v45, 0.0 }
 0x356   :  { %v2204_v25 = vadd.f32 %v2203_v38, %v2202_v3 }
 0x357   :  { %v2841_v20 = vpop.f32.mrf.mxu1  ;;  %v2236_v6 = vmul.f32 %v4876_v18, %v4876_v18  ;;  %v2205_v14 = vsel %vm566_vm3, %v4876_v18, 0.0 }
 0x358   :  { %v2842_v59 = vadd.f32 %v2841_v20, %v2840_v19  ;;  %v2251_v19 = vadd.f32 %v2250_v27, %v2249_v63 }
 0x359   :  { %v2843_v22 = vpop.f32.mrf.mxu1  ;;  %v2258_v52 = vsel %vm566_vm3, %v2236_v6, 0.0 }
 0x35a   :  { %v4883_v8 = vadd.f32 %v2842_v59, %v2159_v32  ;;  %v2253_v40 = vadd.f32 %v2252_v23, %v2251_v19  ;;  %v2206_v32 = vadd.f32 %v2205_v14, %v2204_v25 }
 0x35b   :  { %v2844_v33 = vpop.f32.mrf.mxu1 }
 0x35c   :  { %v2845_v56 = vadd.f32 %v2844_v33, %v2843_v22  ;;  %v2254_v22 = vsel %vm566_vm3, %v2234_v9, 0.0  ;;  %v2207_v35 = vsel %vm566_vm3, %v4883_v8, 0.0 }
 0x35d   :  { %v2208_v5 = vadd.f32 %v2207_v35, %v2206_v32 }
 0x35e   :  { %v4890_v33 = vadd.f32 %v2845_v56, %v2162_v57 }
 0x360   :  { %v2238_v39 = vmul.f32 %v4890_v33, %v4890_v33 }
 0x361   :  { %v2846_v11 = vpop.f32.mrf.mxu1 }
 0x362   :  { %v2262_v54 = vsel %vm566_vm3, %v2238_v39, 0.0 }
 0x363   :  { %v2847_v28 = vpop.f32.mrf.mxu1 }
 0x364   :  { %v2848_v15 = vadd.f32 %v2847_v28, %v2846_v11  ;;  %v2256_v11 = vsel %vm566_vm3, %v2235_v61, 0.0  ;;  %v2237_v28 = vmul.f32 %v4883_v8, %v4883_v8 }
 0x365   :  { %v2849_v44 = vpop.f32.mrf.mxu1 }
 0x366   :  { %v4897_v55 = vadd.f32 %v2908_v31, %v2848_v15  ;;  %v2260_v43 = vsel %vm566_vm3, %v2237_v28, 0.0  ;;  %v2209_v31 = vsel %vm566_vm3, %v4890_v33, 0.0 }
 0x367   :  { %v2850_v17 = vpop.f32.mrf.mxu1 }
 0x368   :  { %v2851_v20 = vadd.f32 %v2850_v17, %v2849_v44  ;;  %v2255_v44 = vadd.f32 %v2254_v22, %v2253_v40  ;;  %v2239_v37 = vmul.f32 %v4897_v55, %v4897_v55  ;;  %v2211_v49 = vsel %vm566_vm3, %v4897_v55, 0.0 }
 0x36a   :  { %v4856_v13 = vpop.f32.mrf.mxu1  ;;  %v4899_v29 = vadd.f32 %v2909_v42, %v2851_v20  ;;  %v2257_v26 = vadd.f32 %v2256_v11, %v2255_v44  ;;  %v2210_v42 = vadd.f32 %v2209_v31, %v2208_v5  ;;  %v2264_v46 = vsel %vm566_vm3, %v2239_v37, 0.0 }
 0x36c   :  { %v2853_v30 = vpop.f32.mrf.mxu1  ;;  %v2259_v50 = vadd.f32 %v2258_v52, %v2257_v26  ;;  %v2240_v10 = vmul.f32 %v4899_v29, %v4899_v29  ;;  %v2213_v27 = vsel %vm566_vm3, %v4899_v29, 0.0  ;;  %v2212_v63 = vadd.f32 %v2211_v49, %v2210_v42 }
 0x36d   :  { %v2854_v48 = vadd.f32 %v2853_v30, %v4856_v13 }
 0x36e   :  { %v2855_v47 = vpop.f32.mrf.mxu1  ;;  %v2261_v59 = vadd.f32 %v2260_v43, %v2259_v50  ;;  %v2266_v2 = vsel %vm566_vm3, %v2240_v10, 0.0  ;;  %v2214_v19 = vadd.f32 %v2213_v27, %v2212_v63 }
 0x370   :  { %v2856_v60 = vpop.f32.mrf.mxu1  ;;  %v2263_v56 = vadd.f32 %v2262_v54, %v2261_v59 }
 0x371   :  { %v2857_v23 = vadd.f32 %v2856_v60, %v2855_v47 }
 0x372   :  { %v2858_v36 = vpop.f32.mrf.mxu1  ;;  %v2265_v57 = vadd.f32 %v2264_v46, %v2263_v56  ;;  %v2190_v56 = vld [vmem:[%s5352_s5] sm:$0x1] }
 0x374   :  { %v2859_v58 = vpop.f32.mrf.mxu1  ;;  %v2267_v6 = vadd.f32 %v2266_v2, %v2265_v57 }
 0x375   :  { %v2860_v4 = vadd.f32 %v2859_v58, %v2858_v36 }
 0x376   :  { %v2861_v17 = vpop.f32.mrf.mxu1 }
 0x378   :  { %v2862_v34 = vpop.f32.mrf.mxu1 }
 0x379   :  { %v2863_v61 = vadd.f32 %v2862_v34, %v2861_v17 }
 0x37a   :  { %v2912_v41 = vpop.f32.mrf.mxu1 }
 0x37b   :  { %v2184_v15 = vadd.f32 %v2912_v41, %v2860_v4 }
 0x37c   :  { %v2175_v51 = vpop.f32.mrf.mxu1 }
 0x37d   :  { %v4920_v9 = vadd.f32 %v2854_v48, %v2175_v51  ;;  %v2243_v40 = vmul.f32 %v2184_v15, %v2184_v15  ;;  %v2219_v11 = vsel %vm566_vm3, %v2184_v15, 0.0 }
 0x37e   :  { %v2913_v53 = vpop.f32.mrf.mxu1 }
 0x37f   :  { %v2215_v13 = vsel %vm566_vm3, %v4920_v9, 0.0  ;;  %v2241_v30 = vmul.f32 %v4920_v9, %v4920_v9  ;;  %v2187_v36 = vadd.f32 %v2913_v53, %v2863_v61  ;;  %v2272_v17 = vsel %vm566_vm3, %v2243_v40, 0.0 }
 0x380   :  { %v2178_v16 = vpop.f32.mrf.mxu1  ;;  %v2216_v38 = vadd.f32 %v2215_v13, %v2214_v19 }
 0x381   :  { %v2268_v20 = vsel %vm566_vm3, %v2241_v30, 0.0  ;;  %v2179_v22 = vadd.f32 %v2857_v23, %v2178_v16  ;;  %v2244_v14 = vmul.f32 %v2187_v36, %v2187_v36  ;;  %v2221_v52 = vsel %vm566_vm3, %v2187_v36, 0.0  ;;  %v2191_v23 = vld [vmem:[%s5353_s6] sm:$0x1] }
 0x382   :  { %v2269_v3 = vadd.f32 %v2268_v20, %v2267_v6 }
 0x383   :  { %v2217_v47 = vsel %vm566_vm3, %v2179_v22, 0.0  ;;  %v2242_v60 = vmul.f32 %v2179_v22, %v2179_v22  ;;  %v2274_v26 = vsel %vm566_vm3, %v2244_v14, 0.0 }
 0x384   :  { %v2218_v58 = vadd.f32 %v2217_v47, %v2216_v38 }
 0x385   :  { %v2270_v28 = vsel %vm566_vm3, %v2242_v60, 0.0 }
 0x386   :  { %v2220_v44 = vadd.f32 %v2219_v11, %v2218_v58  ;;  %v2271_v25 = vadd.f32 %v2270_v28, %v2269_v3  ;;  %v3405_v3 = vld [vmem:[%s5347_s0 + $0x40] sm:$0xff]  ;;  %v3406_v11 = vld [vmem:[%s5347_s0 + $0x48] sm:$0xff]  ;;  %v3407_v28 = vld [vmem:[%s5347_s0 + $0x50] sm:$0xff] }
 0x388   :  { %v2222_v35 = vadd.f32 %v2221_v52, %v2220_v44  ;;  %v2273_v39 = vadd.f32 %v2272_v17, %v2271_v25  ;;  %v3408_v25 = vld [vmem:[%s5347_s0 + $0x58] sm:$0xff]  ;;  %v3409_v52 = vld [vmem:[%s5347_s0 + $0x60] sm:$0xff] }
 0x38a   :  { %v2223_v32 = vrot.slane %v2222_v35, 4  ;;  %v2275_v34 = vadd.f32 %v2274_v26, %v2273_v39  ;;  %v3410_v39 = vld [vmem:[%s5347_s0 + $0x70] sm:$0xff] }
 0x38c   :  { %v2224_v43 = vadd.f32 %v2223_v32, %v2222_v35  ;;  %v2276_v31 = vrot.slane %v2275_v34, 4  ;;  %v3411_v32 = vld [vmem:[%s5347_s0 + $0x78] sm:$0xff] }
 0x38e   :  { %v2225_v37 = vrot.slane %v2224_v43, 2  ;;  %v2277_v50 = vadd.f32 %v2276_v31, %v2275_v34 }
 0x390   :  { %v2226_v5 = vadd.f32 %v2225_v37, %v2224_v43  ;;  %v2278_v10 = vrot.slane %v2277_v50, 2 }
 0x392   :  { %v2227_v41 = vrot.slane %v2226_v5, 1  ;;  %v2279_v54 = vadd.f32 %v2278_v10, %v2277_v50 }
 0x394   :  { %v2228_v49 = vadd.f32 %v2227_v41, %v2226_v5  ;;  %v2280_v48 = vrot.slane %v2279_v54, 1 }
 0x396   :  { %v2281_v59 = vadd.f32 %v2280_v48, %v2279_v54  ;;  %v2282_v42 = vmul.f32 0.0078125, %v2228_v49 }
 0x398   :  { %v2283_v51 = vmul.f32 0.0078125, %v2281_v59  ;;  %v2284_v46 = vmul.f32 %v2282_v42, %v2282_v42 }
 0x39a   :  { %v2285_v27 = vsub.f32 %v2283_v51, %v2284_v46 }
 0x39c   :  { %v2286_v4 = vadd.f32 1e-05, %v2285_v27 }
 0x39e   :  { %3400 = vrsqrt.f32 %v2286_v4 }
 0x3ab   :  { %v3401_v63 = vpop.eup %3400 }
 0x3ac   :  { %v2288_v2 = vmul.f32 %v3401_v63, %v2190_v56 }
 0x3ae   :  { %v2289_v53 = vmul.f32 %v2288_v2, %v2282_v42  ;;  %v4941_v61 = vrot.slane %v2288_v2, %v4164_v1 }
 0x3b0   :  { %v2290_v13 = vsub.f32 %v2191_v23, %v2289_v53  ;;  %v2310_v30 = vmul.f32 %v4941_v61, %v2179_v22  ;;  %v2305_v57 = vmul.f32 %v4941_v61, %v4883_v8  ;;  %v2306_v19 = vmul.f32 %v4941_v61, %v4890_v33 }
 0x3b1   :  { %v2307_v16 = vmul.f32 %v4941_v61, %v4897_v55  ;;  %v2308_v20 = vmul.f32 %v4941_v61, %v4899_v29  ;;  %v2309_v38 = vmul.f32 %v4941_v61, %v4920_v9  ;;  %v2311_v6 = vmul.f32 %v4941_v61, %v2184_v15 }
 0x3b2   :  { %v4956_v22 = vrot.slane %v2290_v13, %v4164_v1  ;;  %v2312_v8 = vmul.f32 %v4941_v61, %v2187_v36  ;;  %v2297_v33 = vmul.f32 %v4941_v61, %v4836_v21  ;;  %v2298_v55 = vmul.f32 %v4941_v61, %v4834_v7 }
 0x3b3   :  { %v2299_v29 = vmul.f32 %v4941_v61, %v4838_v0  ;;  %v2300_v9 = vmul.f32 %v4941_v61, %v4840_v12  ;;  %v2301_v1 = vmul.f32 %v4941_v61, %v4846_v24  ;;  %v2302_v15 = vmul.f32 %v4941_v61, %v4861_v62  ;;  %v3404_v62 = vld [vmem:[%s5347_s0 + $0x68] sm:$0xff] }
 0x3b4   :  { %v2332_v36 = vadd.f32 %v4956_v22, %v2310_v30  ;;  %v2327_v21 = vadd.f32 %v4956_v22, %v2305_v57  ;;  %v2328_v40 = vadd.f32 %v4956_v22, %v2306_v19  ;;  %v2329_v7 = vadd.f32 %v4956_v22, %v2307_v16 }
 0x3b5   :  { %v2330_v0 = vadd.f32 %v4956_v22, %v2308_v20  ;;  %v2331_v47 = vadd.f32 %v4956_v22, %v2309_v38  ;;  %v2333_v12 = vadd.f32 %v4956_v22, %v2311_v6  ;;  %v2334_v24 = vadd.f32 %v4956_v22, %v2312_v8  ;;  %v3412_v20 = vld [vmem:[%s5347_s0] sm:$0xff]  ;;  %v3413_v6 = vld [vmem:[%s5347_s0 + $0x8] sm:$0xff] }
 0x3b6   :  { %v2348_v60 = vadd.f32 %v3404_v62, %v2332_v36  ;;  %v2343_v58 = vadd.f32 %v3405_v3, %v2327_v21  ;;  %v2344_v14 = vadd.f32 %v3406_v11, %v2328_v40  ;;  %v2345_v44 = vadd.f32 %v3407_v28, %v2329_v7  ;;  %v3417_v36 = vld [vmem:[%s5347_s0 + $0x28] sm:$0xff]  ;;  %v3418_v7 = vld [vmem:[%s5347_s0 + $0x30] sm:$0xff] }
 0x3b7   :  { %v2346_v17 = vadd.f32 %v3408_v25, %v2330_v0  ;;  %v2347_v35 = vadd.f32 %v3409_v52, %v2331_v47  ;;  %v2349_v26 = vadd.f32 %v3410_v39, %v2333_v12  ;;  %v2350_v34 = vadd.f32 %v3411_v32, %v2334_v24  ;;  %v3419_v47 = vld [vmem:[%s5347_s0 + $0x38] sm:$0xff] }
 0x3b8   :  { %v5003_v43 = vmax.f32 %v2348_v60, 0.0  ;;  %v5005_v31 = vmax.f32 %v2343_v58, 0.0  ;;  %v5007_v37 = vmax.f32 %v2344_v14, 0.0  ;;  %v5009_v50 = vmax.f32 %v2345_v44, 0.0 }
 0x3b9   :  { %v5011_v5 = vmax.f32 %v2346_v17, 0.0  ;;  %v5013_v10 = vmax.f32 %v2347_v35, 0.0  ;;  %v5015_v41 = vmax.f32 %v2349_v26, 0.0  ;;  %v5017_v54 = vmax.f32 %v2350_v34, 0.0 }
 0x3ba   :  { %v2434_v49 = vrot.slane %v5005_v31, 1  ;;  %v2436_v48 = vrot.slane %v5009_v50, 7  ;;  %v2442_v59 = vrot.slane %v5003_v43, 4  ;;  %v2303_v42 = vmul.f32 %v4941_v61, %v4869_v45 }
 0x3bb   :  { %v2438_v51 = vrot.slane %v5011_v5, 6  ;;  %v2440_v46 = vrot.slane %v5013_v10, 5  ;;  %v2444_v27 = vrot.slane %v5015_v41, 3  ;;  %v2446_v4 = vrot.slane %v5017_v54, 2 }
 0x3bc   :  { %v2435_v56 = vsel %vm2384_vm6, %v5007_v37, %v2434_v49  ;;  %v2304_v63 = vmul.f32 %v4941_v61, %v4876_v18  ;;  %v2319_v2 = vadd.f32 %v4956_v22, %v2297_v33  ;;  %v2320_v23 = vadd.f32 %v4956_v22, %v2298_v55  ;;  %v3414_v33 = vld [vmem:[%s5347_s0 + $0x10] sm:$0xff] }
 0x3bd   :  { %v2437_v45 = vsel %vm2387_vm7, %v2436_v48, %v2435_v56  ;;  %v2321_v53 = vadd.f32 %v4956_v22, %v2299_v29  ;;  %v2322_v13 = vadd.f32 %v4956_v22, %v2300_v9  ;;  %v2323_v30 = vadd.f32 %v4956_v22, %v2301_v1  ;;  %v3416_v1 = vld [vmem:[%s5347_s0 + $0x20] sm:$0xff] }
 0x3be   :  { %v2439_v57 = vsel %vm2390_vm8, %v2438_v51, %v2437_v45  ;;  %v2324_v19 = vadd.f32 %v4956_v22, %v2302_v15  ;;  %v2325_v16 = vadd.f32 %v4956_v22, %v2303_v42  ;;  %v2326_v18 = vadd.f32 %v4956_v22, %v2304_v63  ;;  %v3415_v22 = vld [vmem:[%s5347_s0 + $0x18] sm:$0xff] }
 0x3bf   :  { %v2441_v61 = vsel %vm2393_vm9, %v2440_v46, %v2439_v57  ;;  %v2335_v38 = vadd.f32 %v3412_v20, %v2319_v2  ;;  %v2336_v8 = vadd.f32 %v3413_v6, %v2320_v23  ;;  %v2337_v55 = vadd.f32 %v3414_v33, %v2321_v53 }
 0x3c0   :  { %v2443_v29 = vsel %vm2396_vm10, %v2442_v59, %v2441_v61  ;;  %v2338_v9 = vadd.f32 %v3415_v22, %v2322_v13  ;;  %v2339_v15 = vadd.f32 %v3416_v1, %v2323_v30  ;;  %v2340_v21 = vadd.f32 %v3417_v36, %v2324_v19 }
 0x3c1   :  { %v2445_v40 = vsel %vm2399_vm11, %v2444_v27, %v2443_v29  ;;  %v2341_v0 = vadd.f32 %v3418_v7, %v2325_v16  ;;  %v2342_v12 = vadd.f32 %v3419_v47, %v2326_v18  ;;  %v5069_v24 = vmax.f32 %v2335_v38, 0.0 }
 0x3c2   :  { %v2447_v62 = vsel %vm2402_vm12, %v2446_v4, %v2445_v40  ;;  %v5072_v60 = vmax.f32 %v2337_v55, 0.0  ;;  %v5074_v3 = vmax.f32 %v2338_v9, 0.0  ;;  %v5077_v58 = vmax.f32 %v2339_v15, 0.0 }
 0x3c3   :  { %2450 = vrot.lane.b32.xlu1 %v2447_v62, %s3422_s22  ;;  %v5079_v11 = vmax.f32 %v2340_v21, 0.0  ;;  %v5081_v14 = vmax.f32 %v2341_v0, 0.0  ;;  %v5083_v28 = vmax.f32 %v2342_v12, 0.0  ;;  %v5085_v44 = vmax.f32 %v2336_v8, 0.0 }
 0x3c4   :  { %v2420_v25 = vrot.slane %v5069_v24, 1  ;;  %v2422_v17 = vrot.slane %v5072_v60, 7  ;;  %v2566_v52 = vrot.slane %v5005_v31, 5  ;;  %v2424_v35 = vrot.slane %v5074_v3, 6 }
 0x3c5   :  { %v2426_v39 = vrot.slane %v5077_v58, 5  ;;  %v2428_v26 = vrot.slane %v5079_v11, 4  ;;  %v2430_v32 = vrot.slane %v5081_v14, 3  ;;  %v2432_v49 = vrot.slane %v5083_v28, 2 }
 0x3c6   :  { %v2421_v34 = vsel %vm2384_vm6, %v5085_v44, %v2420_v25  ;;  %v2567_v48 = vrot.slane %v5007_v37, 4  ;;  %v2569_v59 = vrot.slane %v5009_v50, 3  ;;  %v2571_v51 = vrot.slane %v5011_v5, 2 }
 0x3c7   :  { %v2423_v42 = vsel %vm2387_vm7, %v2422_v17, %v2421_v34  ;;  %v2573_v46 = vrot.slane %v5013_v10, 1  ;;  %v2576_v27 = vrot.slane %v5015_v41, 7  ;;  %v2552_v63 = vrot.slane %v5069_v24, 5 }
 0x3c8   :  { %v2425_v4 = vsel %vm2390_vm8, %v2424_v35, %v2423_v42  ;;  %v2568_v56 = vsel %vm2384_vm6, %v2567_v48, %v2566_v52  ;;  %v2553_v2 = vrot.slane %v5085_v44, 4  ;;  %v2578_v53 = vrot.slane %v5017_v54, 6 }
 0x3c9   :  { %v2427_v23 = vsel %vm2393_vm9, %v2426_v39, %v2425_v4  ;;  %v2570_v45 = vsel %vm2387_vm7, %v2569_v59, %v2568_v56  ;;  %v2555_v13 = vrot.slane %v5072_v60, 3  ;;  %v2557_v16 = vrot.slane %v5074_v3, 2 }
 0x3ca   :  { %v2429_v30 = vsel %vm2396_vm10, %v2428_v26, %v2427_v23  ;;  %v2572_v57 = vsel %vm2390_vm8, %v2571_v51, %v2570_v45  ;;  %v2554_v19 = vsel %vm2384_vm6, %v2553_v2, %v2552_v63  ;;  %v2559_v38 = vrot.slane %v5077_v58, 1 }
 0x3cb   :  { %v2431_v18 = vsel %vm2399_vm11, %v2430_v32, %v2429_v30  ;;  %v2574_v61 = vsel %vm2393_vm9, %v2573_v46, %v2572_v57  ;;  %v2556_v20 = vsel %vm2387_vm7, %v2555_v13, %v2554_v19  ;;  %v2562_v55 = vrot.slane %v5081_v14, 7 }
 0x3cc   :  { %v2433_v6 = vsel %vm2402_vm12, %v2432_v49, %v2431_v18  ;;  %v2575_v8 = vsel %vm2396_vm10, %v5003_v43, %v2574_v61  ;;  %v2558_v33 = vsel %vm2390_vm8, %v2557_v16, %v2556_v20  ;;  %v2468_v9 = vrot.slane %v5005_v31, 2 }
 0x3cd   :  { %2448 = vrot.lane.b32.xlu0 %v2433_v6, %s3422_s22  ;;  %v2577_v29 = vsel %vm2399_vm11, %v2576_v27, %v2575_v8  ;;  %v2560_v22 = vsel %vm2393_vm9, %v2559_v38, %v2558_v33  ;;  %v2469_v1 = vrot.slane %v5007_v37, 1  ;;  %v2564_v21 = vrot.slane %v5083_v28, 6 }
 0x3ce   :  { %v2579_v15 = vsel %vm2402_vm12, %v2578_v53, %v2577_v29  ;;  %v2561_v36 = vsel %vm2396_vm10, %v5079_v11, %v2560_v22  ;;  %v2472_v40 = vrot.slane %v5011_v5, 7  ;;  %v2474_v47 = vrot.slane %v5013_v10, 6 }
 0x3cf   :  { %2582 = vrot.lane.b32.xlu1 %v2579_v15, %s3422_s22  ;;  %v2563_v7 = vsel %vm2399_vm11, %v2562_v55, %v2561_v36  ;;  %v2470_v0 = vsel %vm2384_vm6, %v2469_v1, %v2468_v9  ;;  %v2476_v12 = vrot.slane %v5003_v43, 5  ;;  %v2478_v17 = vrot.slane %v5015_v41, 4 }
 0x3d0   :  { %v2565_v62 = vsel %vm2402_vm12, %v2564_v21, %v2563_v7  ;;  %v2471_v25 = vsel %vm2387_vm7, %v5009_v50, %v2470_v0  ;;  %v2454_v52 = vrot.slane %v5069_v24, 2  ;;  %v2480_v39 = vrot.slane %v5017_v54, 3 }
 0x3d1   :  { %2580 = vrot.lane.b32.xlu0 %v2565_v62, %s3422_s22  ;;  %v2473_v35 = vsel %vm2390_vm8, %v2472_v40, %v2471_v25  ;;  %v2455_v26 = vrot.slane %v5085_v44, 1  ;;  %v2458_v32 = vrot.slane %v5074_v3, 7  ;;  %v2460_v49 = vrot.slane %v5077_v58, 6 }
 0x3d2   :  { %v2475_v34 = vsel %vm2393_vm9, %v2474_v47, %v2473_v35  ;;  %v2462_v48 = vrot.slane %v5079_v11, 5  ;;  %v2464_v59 = vrot.slane %v5081_v14, 4  ;;  %v2600_v46 = vrot.slane %v5005_v31, 6 }
 0x3d3   :  { %v2477_v42 = vsel %vm2396_vm10, %v2476_v12, %v2475_v34  ;;  %v2456_v51 = vsel %vm2384_vm6, %v2455_v26, %v2454_v52  ;;  %v2601_v27 = vrot.slane %v5007_v37, 5  ;;  %v2466_v63 = vrot.slane %v5083_v28, 3 }
 0x3d4   :  { %v2479_v4 = vsel %vm2399_vm11, %v2478_v17, %v2477_v42  ;;  %v2457_v56 = vsel %vm2387_vm7, %v5072_v60, %v2456_v51  ;;  %v2603_v2 = vrot.slane %v5009_v50, 4  ;;  %v2605_v13 = vrot.slane %v5011_v5, 3 }
 0x3d5   :  { %v2481_v23 = vsel %vm2402_vm12, %v2480_v39, %v2479_v4  ;;  %v2459_v45 = vsel %vm2390_vm8, %v2458_v32, %v2457_v56  ;;  %v2602_v53 = vsel %vm2384_vm6, %v2601_v27, %v2600_v46  ;;  %v2607_v19 = vrot.slane %v5013_v10, 2 }
 0x3d6   :  { %2484 = vrot.lane.b32.xlu1 %v2481_v23, %s3421_s11  ;;  %v2461_v30 = vsel %vm2393_vm9, %v2460_v49, %v2459_v45  ;;  %v2604_v57 = vsel %vm2387_vm7, %v2603_v2, %v2602_v53  ;;  %v2609_v16 = vrot.slane %v5003_v43, 1  ;;  %v2586_v20 = vrot.slane %v5069_v24, 6 }
 0x3d7   :  { %v2463_v18 = vsel %vm2396_vm10, %v2462_v48, %v2461_v30  ;;  %v2606_v61 = vsel %vm2390_vm8, %v2605_v13, %v2604_v57  ;;  %v2587_v38 = vrot.slane %v5085_v44, 5  ;;  %v2612_v33 = vrot.slane %v5017_v54, 7 }
 0x3d8   :  { %v2465_v6 = vsel %vm2399_vm11, %v2464_v59, %v2463_v18  ;;  %v2608_v8 = vsel %vm2393_vm9, %v2607_v19, %v2606_v61  ;;  %v2589_v55 = vrot.slane %v5072_v60, 4  ;;  %v2591_v1 = vrot.slane %v5074_v3, 3 }
 0x3d9   :  { %v2467_v29 = vsel %vm2402_vm12, %v2466_v63, %v2465_v6  ;;  %v2610_v22 = vsel %vm2396_vm10, %v2609_v16, %v2608_v8  ;;  %v2588_v9 = vsel %vm2384_vm6, %v2587_v38, %v2586_v20  ;;  %v2593_v21 = vrot.slane %v5077_v58, 2 }
 0x3da   :  { %2482 = vrot.lane.b32.xlu0 %v2467_v29, %s3421_s11  ;;  %v2611_v15 = vsel %vm2399_vm11, %v5015_v41, %v2610_v22  ;;  %v2590_v36 = vsel %vm2387_vm7, %v2589_v55, %v2588_v9  ;;  %v2595_v40 = vrot.slane %v5079_v11, 1  ;;  %v2502_v47 = vrot.slane %v5005_v31, 3 }
 0x3db   :  { %v2613_v7 = vsel %vm2402_vm12, %v2612_v33, %v2611_v15  ;;  %v2592_v0 = vsel %vm2390_vm8, %v2591_v1, %v2590_v36  ;;  %v2503_v12 = vrot.slane %v5007_v37, 2  ;;  %v2598_v25 = vrot.slane %v5083_v28, 7 }
 0x3dc   :  { %2616 = vrot.lane.b32.xlu1 %v2613_v7, %s3421_s11  ;;  %v2594_v62 = vsel %vm2393_vm9, %v2593_v21, %v2592_v0  ;;  %v2505_v17 = vrot.slane %v5009_v50, 1  ;;  %v2508_v52 = vrot.slane %v5013_v10, 7  ;;  %v2510_v26 = vrot.slane %v5003_v43, 6 }
 0x3dd   :  { %v2596_v35 = vsel %vm2396_vm10, %v2595_v40, %v2594_v62  ;;  %v2504_v39 = vsel %vm2384_vm6, %v2503_v12, %v2502_v47  ;;  %v2512_v32 = vrot.slane %v5015_v41, 5  ;;  %v2488_v48 = vrot.slane %v5069_v24, 3 }
 0x3de   :  { %v2597_v34 = vsel %vm2399_vm11, %v5081_v14, %v2596_v35  ;;  %v2506_v49 = vsel %vm2387_vm7, %v2505_v17, %v2504_v39  ;;  %v2489_v59 = vrot.slane %v5085_v44, 2  ;;  %v2514_v46 = vrot.slane %v5017_v54, 4 }
 0x3df   :  { %v2599_v42 = vsel %vm2402_vm12, %v2598_v25, %v2597_v34  ;;  %v2507_v51 = vsel %vm2390_vm8, %v5011_v5, %v2506_v49  ;;  %v2491_v27 = vrot.slane %v5072_v60, 1  ;;  %v2494_v63 = vrot.slane %v5077_v58, 7 }
 0x3e0   :  { %2614 = vrot.lane.b32.xlu0 %v2599_v42, %s3421_s11  ;;  %v2509_v4 = vsel %vm2393_vm9, %v2508_v52, %v2507_v51  ;;  %v2490_v56 = vsel %vm2384_vm6, %v2489_v59, %v2488_v48  ;;  %v2496_v2 = vrot.slane %v5079_v11, 6  ;;  %v2498_v53 = vrot.slane %v5081_v14, 5 }
 0x3e1   :  { %v2511_v23 = vsel %vm2396_vm10, %v2510_v26, %v2509_v4  ;;  %v2492_v45 = vsel %vm2387_vm7, %v2491_v27, %v2490_v56  ;;  %v2634_v13 = vrot.slane %v5005_v31, 7  ;;  %v2635_v19 = vrot.slane %v5007_v37, 6 }
 0x3e2   :  { %v2513_v30 = vsel %vm2399_vm11, %v2512_v32, %v2511_v23  ;;  %v2493_v57 = vsel %vm2390_vm8, %v5074_v3, %v2492_v45  ;;  %v2637_v16 = vrot.slane %v5009_v50, 5  ;;  %v2500_v20 = vrot.slane %v5083_v28, 4 }
 0x3e3   :  { %v2515_v18 = vsel %vm2402_vm12, %v2514_v46, %v2513_v30  ;;  %v2495_v61 = vsel %vm2393_vm9, %v2494_v63, %v2493_v57  ;;  %v2639_v38 = vrot.slane %v5011_v5, 4  ;;  %v2636_v8 = vsel %vm2384_vm6, %v2635_v19, %v2634_v13 }
 0x3e4   :  { %2518 = vrot.lane.b32.xlu1 %v2515_v18, %s3423_s23  ;;  %v2497_v6 = vsel %vm2396_vm10, %v2496_v2, %v2495_v61  ;;  %v2641_v33 = vrot.slane %v5013_v10, 3  ;;  %v2643_v55 = vrot.slane %v5003_v43, 2  ;;  %v2638_v22 = vsel %vm2387_vm7, %v2637_v16, %v2636_v8 }
 0x3e5   :  { %v2499_v29 = vsel %vm2399_vm11, %v2498_v53, %v2497_v6  ;;  %v2620_v9 = vrot.slane %v5069_v24, 7  ;;  %v2621_v1 = vrot.slane %v5085_v44, 6  ;;  %v2640_v36 = vsel %vm2390_vm8, %v2639_v38, %v2638_v22 }
 0x3e6   :  { %v2501_v15 = vsel %vm2402_vm12, %v2500_v20, %v2499_v29  ;;  %v2645_v21 = vrot.slane %v5015_v41, 1  ;;  %v2623_v40 = vrot.slane %v5072_v60, 5  ;;  %v2642_v7 = vsel %vm2393_vm9, %v2641_v33, %v2640_v36 }
 0x3e7   :  { %2516 = vrot.lane.b32.xlu0 %v2501_v15, %s3423_s23  ;;  %v2622_v0 = vsel %vm2384_vm6, %v2621_v1, %v2620_v9  ;;  %v2625_v47 = vrot.slane %v5074_v3, 4  ;;  %v2627_v12 = vrot.slane %v5077_v58, 3  ;;  %v2644_v62 = vsel %vm2396_vm10, %v2643_v55, %v2642_v7 }
 0x3e8   :  { %v2624_v25 = vsel %vm2387_vm7, %v2623_v40, %v2622_v0  ;;  %v2629_v17 = vrot.slane %v5079_v11, 2  ;;  %v2404_v52 = vrot.slane %v5007_v37, 7  ;;  %v2646_v35 = vsel %vm2399_vm11, %v2645_v21, %v2644_v62 }
 0x3e9   :  { %v2626_v39 = vsel %vm2390_vm8, %v2625_v47, %v2624_v25  ;;  %v2631_v26 = vrot.slane %v5081_v14, 1  ;;  %v2406_v32 = vrot.slane %v5009_v50, 6  ;;  %v2647_v34 = vsel %vm2402_vm12, %v5017_v54, %v2646_v35 }
 0x3ea   :  { %v2628_v49 = vsel %vm2393_vm9, %v2627_v12, %v2626_v39  ;;  %v2408_v48 = vrot.slane %v5011_v5, 5  ;;  %v2410_v59 = vrot.slane %v5013_v10, 4  ;;  %2650 = vrot.lane.b32.xlu1 %v2647_v34, %s3423_s23  ;;  %v2412_v51 = vrot.slane %v5003_v43, 3 }
 0x3eb   :  { %v2630_v42 = vsel %vm2396_vm10, %v2629_v17, %v2628_v49  ;;  %v2414_v46 = vrot.slane %v5015_v41, 2  ;;  %v2405_v27 = vsel %vm2384_vm6, %v2404_v52, %v5005_v31  ;;  %v2383_v63 = vrot.slane %v5085_v44, 7 }
 0x3ec   :  { %v2632_v4 = vsel %vm2399_vm11, %v2631_v26, %v2630_v42  ;;  %v2407_v56 = vsel %vm2387_vm7, %v2406_v32, %v2405_v27  ;;  %v2386_v2 = vrot.slane %v5072_v60, 6  ;;  %v2416_v45 = vrot.slane %v5017_v54, 1 }
 0x3ed   :  { %v2633_v23 = vsel %vm2402_vm12, %v5083_v28, %v2632_v4  ;;  %v2409_v53 = vsel %vm2390_vm8, %v2408_v48, %v2407_v56  ;;  %v2389_v13 = vrot.slane %v5074_v3, 5  ;;  %v2392_v57 = vrot.slane %v5077_v58, 4 }
 0x3ee   :  { %2648 = vrot.lane.b32.xlu0 %v2633_v23, %s3423_s23  ;;  %v2411_v30 = vsel %vm2393_vm9, %v2410_v59, %v2409_v53  ;;  %v2395_v19 = vrot.slane %v5079_v11, 3  ;;  %v2398_v16 = vrot.slane %v5081_v14, 2  ;;  %v2385_v61 = vsel %vm2384_vm6, %v2383_v63, %v5069_v24 }
 0x3ef   :  { %v2413_v18 = vsel %vm2396_vm10, %v2412_v51, %v2411_v30  ;;  %v2536_v20 = vrot.slane %v5005_v31, 4  ;;  %v2537_v38 = vrot.slane %v5007_v37, 3  ;;  %v2401_v8 = vrot.slane %v5083_v28, 1 }
 0x3f0   :  { %v2415_v6 = vsel %vm2399_vm11, %v2414_v46, %v2413_v18  ;;  %v2388_v33 = vsel %vm2387_vm7, %v2386_v2, %v2385_v61  ;;  %v2539_v55 = vrot.slane %v5009_v50, 2  ;;  %v2541_v1 = vrot.slane %v5011_v5, 1 }
 0x3f1   :  { %v2417_v29 = vsel %vm2402_vm12, %v2416_v45, %v2415_v6  ;;  %v2391_v22 = vsel %vm2390_vm8, %v2389_v13, %v2388_v33  ;;  %v2538_v9 = vsel %vm2384_vm6, %v2537_v38, %v2536_v20  ;;  %v2544_v15 = vrot.slane %v5003_v43, 7 }
 0x3f2   :  { %v2394_v31 = vsel %vm2393_vm9, %v2392_v57, %v2391_v22  ;;  %v2540_v37 = vsel %vm2387_vm7, %v2539_v55, %v2538_v9  ;;  %v2546_v36 = vrot.slane %v5015_v41, 6  ;;  %v2522_v40 = vrot.slane %v5069_v24, 4 }
 0x3f3   :  { %v2397_v21 = vsel %vm2396_vm10, %v2395_v19, %v2394_v31  ;;  %v2542_v50 = vsel %vm2390_vm8, %v2541_v1, %v2540_v37  ;;  %v2523_v7 = vrot.slane %v5085_v44, 3  ;;  %v2548_v47 = vrot.slane %v5017_v54, 5 }
 0x3f4   :  { %v2400_v0 = vsel %vm2399_vm11, %v2398_v16, %v2397_v21  ;;  %v2543_v5 = vsel %vm2393_vm9, %v5013_v10, %v2542_v50  ;;  %v2525_v12 = vrot.slane %v5072_v60, 2  ;;  %v2527_v25 = vrot.slane %v5074_v3, 1 }
 0x3f5   :  { %v2403_v43 = vsel %vm2402_vm12, %v2401_v8, %v2400_v0  ;;  %v2545_v41 = vsel %vm2396_vm10, %v2544_v15, %v2543_v5  ;;  %v2524_v62 = vsel %vm2384_vm6, %v2523_v7, %v2522_v40  ;;  %v2530_v54 = vrot.slane %v5079_v11, 7 }
 0x3f6   :  { %v2547_v24 = vsel %vm2399_vm11, %v2546_v36, %v2545_v41  ;;  %v2526_v44 = vsel %vm2387_vm7, %v2525_v12, %v2524_v62  ;;  %v2532_v52 = vrot.slane %v5081_v14, 6  ;;  %v2534_v39 = vrot.slane %v5083_v28, 5 }
 0x3f7   :  { %v2549_v17 = vsel %vm2402_vm12, %v2548_v47, %v2547_v24  ;;  %v2528_v10 = vsel %vm2390_vm8, %v2527_v25, %v2526_v44 }
 0x3f8   :  { %v2529_v60 = vsel %vm2393_vm9, %v5077_v58, %v2528_v10 }
 0x3f9   :  { %v2531_v35 = vsel %vm2396_vm10, %v2530_v54, %v2529_v60 }
 0x3fa   :  { %v2533_v3 = vsel %vm2399_vm11, %v2532_v52, %v2531_v35 }
 0x3fb   :  { %v2535_v26 = vsel %vm2402_vm12, %v2534_v39, %v2533_v3 }
 0x435   :  { %v2451_v32 = vpop.permute.xlu1 %2450 }
 0x436   :  { %v2655_v58 = vsel %vm566_vm3, %v2417_v29, %v2451_v32 }
 0x43f   :  { %v2449_v34 = vpop.permute.xlu0 %2448 }
 0x440   :  { %v2654_v28 = vsel %vm566_vm3, %v2403_v43, %v2449_v34 }
 0x441   :  { %v2583_v49 = vpop.permute.xlu1 %2582 }
 0x442   :  { %v2661_v2 = vsel %vm566_vm3, %v2549_v17, %v2583_v49 }
 0x443   :  { %v2581_v48 = vpop.permute.xlu0 %2580 }
 0x444   :  { %v2660_v13 = vsel %vm566_vm3, %v2535_v26, %v2581_v48 }
 0x448   :  { %v2485_v59 = vpop.permute.xlu1 %2484 }
 0x449   :  { %v2657_v14 = vsel %vm582_vm4, %v2655_v58, %v2485_v59 }
 0x44c   :  { %v2483_v42 = vpop.permute.xlu0 %2482 }
 0x44d   :  { %v2656_v4 = vsel %vm582_vm4, %v2654_v28, %v2483_v42 }
 0x44e   :  { %v2617_v11 = vpop.permute.xlu1 %2616 }
 0x44f   :  { %v2663_v23 = vsel %vm582_vm4, %v2661_v2, %v2617_v11 }
 0x452   :  { %v2615_v51 = vpop.permute.xlu0 %2614 }
 0x453   :  { %v2662_v30 = vsel %vm582_vm4, %v2660_v13, %v2615_v51 }
 0x456   :  { %v2519_v46 = vpop.permute.xlu1 %2518 }
 0x457   :  { %v2659_v27 = vsel %vm598_vm5, %v2657_v14, %v2519_v46 }
 0x458   :  { %2668 = vst [vmem:[%s5354_s7 + $0x10] sm:$0xff] %v2659_v27 }
 0x459   :  { %v2517_v56 = vpop.permute.xlu0 %2516 }
 0x45a   :  { %v2658_v63 = vsel %vm598_vm5, %v2656_v4, %v2517_v56 }
 0x45b   :  { %2666 = vst [vmem:[%s5354_s7] sm:$0xff] %v2658_v63 }
 0x45c   :  { %v2651_v45 = vpop.permute.xlu1 %2650 }
 0x45d   :  { %v2665_v53 = vsel %vm598_vm5, %v2663_v23, %v2651_v45 }
 0x45e   :  { %2669 = vst [vmem:[%s5354_s7 + $0x18] sm:$0xff] %v2665_v53 }
 0x460   :  { %v2649_v57 = vpop.permute.xlu0 %2648 }
 0x461   :  { %v2664_v19 = vsel %vm598_vm5, %v2662_v30, %v2649_v57 }
 0x462   :  { %2667 = vst [vmem:[%s5354_s7 + $0x8] sm:$0xff] %v2664_v19 }

</bundles_post_ra>
